<compile_context>
chip_gen: v7x
topology: tpu7x:2x2x1
jax: 0.10.0
libtpu: 0.0.40
codegen_flags: <defaults>
</compile_context>

<pallas_src>
import functools

import jax
import jax.numpy as jnp
from jax.experimental import pallas as pl
from jax.experimental.pallas import tpu as pltpu


def _round_up(n, m):
    return ((n + m - 1) // m) * m


def _vae_fwd_kernel(x_ref, eps_ref,
                    w_e1_ref, b_e1_ref,
                    w_e2_ref, b_e2_ref,
                    w_d1_ref, b_d1_ref,
                    w_d2_ref, b_d2_ref,
                    out_ref, muvar_ref,
                    *, z_dim):
    cdt = w_e1_ref.dtype  # compute dtype for MXU inputs (f32 or bf16)
    x = x_ref[...]

    # ---- encode: h = tanh(x @ W_e1 + b_e1) ----
    h = jnp.tanh(
        jnp.dot(x.astype(cdt), w_e1_ref[...],
                preferred_element_type=jnp.float32) + b_e1_ref[...]
    )

    # ---- fused heads: [mu | logvar] = h @ [W_e21 | W_e22] + [b_e21 | b_e22] ----
    muvar = (jnp.dot(h.astype(cdt), w_e2_ref[...],
                     preferred_element_type=jnp.float32) + b_e2_ref[...])
    mu = muvar[:, :z_dim]
    logvar = muvar[:, z_dim:]

    # ---- reparameterize: z = mu + eps * exp(0.5 * logvar) ----
    std = jnp.exp(0.5 * logvar)
    z = mu + eps_ref[...] * std

    # ---- decode ----
    hd = jnp.tanh(
        jnp.dot(z.astype(cdt), w_d1_ref[...],
                preferred_element_type=jnp.float32) + b_d1_ref[...]
    )
    o = (jnp.dot(hd.astype(cdt), w_d2_ref[...],
                 preferred_element_type=jnp.float32) + b_d2_ref[...])

    # ---- softmax over dim=1 (feature axis) ----
    o = o - jnp.max(o, axis=1, keepdims=True)
    e = jnp.exp(o)
    denom = jnp.sum(e, axis=1, keepdims=True)
    out_ref[...] = (e * pl.reciprocal(denom, approx=True)).astype(out_ref.dtype)

    muvar_ref[...] = muvar.astype(muvar_ref.dtype)


def vae_forward(x, eps, params, *, block_b=128):
    """Pallas VAE forward. Returns (reconstruction, mu, logvar)."""
    B, D = x.shape
    Z = eps.shape[1]
    H = params["w_e1"].shape[1]

    # Fuse the two encoder heads into one lane-dense (H, 2Z) weight / (1, 2Z) bias.
    w_e2 = jnp.concatenate([params["w_e21"], params["w_e22"]], axis=1)
    b_e2 = jnp.concatenate([params["b_e21"], params["b_e22"]], axis=1)

    # Batch tile: multiple of 8 sublanes; pad batch up to a whole number of tiles.
    tb = min(block_b, _round_up(B, 8))
    b_pad = _round_up(B, tb)
    if b_pad != B:
        x = jnp.pad(x, ((0, b_pad - B), (0, 0)))
        eps = jnp.pad(eps, ((0, b_pad - B), (0, 0)))
    nb = b_pad // tb

    args = (x, eps,
            params["w_e1"], params["b_e1"],
            w_e2, b_e2,
            params["w_d1"], params["b_d1"],
            params["w_d2"], params["b_d2"])

    def batch_spec(cols):
        return pl.BlockSpec((tb, cols), lambda i: (i, 0))

    def const_spec(a):
        # Full-array block, constant index -> stays resident in VMEM across steps.
        return pl.BlockSpec(a.shape, lambda i: (0, 0))

    in_specs = [batch_spec(D), batch_spec(Z)] + [const_spec(a) for a in args[2:]]
    out_specs = (batch_spec(D), batch_spec(2 * Z))
    out_shape = (jax.ShapeDtypeStruct((b_pad, D), jnp.float32),
                 jax.ShapeDtypeStruct((b_pad, 2 * Z), jnp.float32))

    w_bytes = sum(int(a.size) * a.dtype.itemsize for a in args[2:])
    cost = pl.CostEstimate(
        flops=2 * b_pad * (D * H + H * 2 * Z + Z * H + H * D),
        transcendentals=b_pad * (2 * H + Z + D),
        bytes_accessed=int(x.size + eps.size) * 4 + w_bytes
        + b_pad * (D + 2 * Z) * 4,
    )

    out, muvar = pl.pallas_call(
        functools.partial(_vae_fwd_kernel, z_dim=Z),
        grid=(nb,),
        in_specs=in_specs,
        out_specs=out_specs,
        out_shape=out_shape,
        compiler_params=pltpu.CompilerParams(
            dimension_semantics=("parallel",),
            vmem_limit_bytes=32 * 1024 * 1024,
        ),
        cost_estimate=cost,
    )(*args)

    return out[:B], muvar[:B, :Z], muvar[:B, Z:]


def init_params(key, data_dim, z_dim, h_dim, dtype=jnp.float32):
    """PyTorch-style Linear init: U(-1/sqrt(fan_in), 1/sqrt(fan_in)).

    Weights are stored as (in_features, out_features); biases as (1, out)."""
    def linear(k, fan_in, fan_out):
        kw, kb = jax.random.split(k)
        bound = 1.0 / jnp.sqrt(fan_in)
        w = jax.random.uniform(kw, (fan_in, fan_out), jnp.float32, -bound, bound)
        b = jax.random.uniform(kb, (1, fan_out), jnp.float32, -bound, bound)
        return w.astype(dtype), b  # biases stay f32 (added post-accumulation)

    keys = jax.random.split(key, 5)
    w_e1, b_e1 = linear(keys[0], data_dim, h_dim)
    w_e21, b_e21 = linear(keys[1], h_dim, z_dim)
    w_e22, b_e22 = linear(keys[2], h_dim, z_dim)
    w_d1, b_d1 = linear(keys[3], z_dim, h_dim)
    w_d2, b_d2 = linear(keys[4], h_dim, data_dim)
    return dict(
        w_e1=w_e1, b_e1=b_e1,
        w_e21=w_e21, b_e21=b_e21,
        w_e22=w_e22, b_e22=b_e22,
        w_d1=w_d1, b_d1=b_d1,
        w_d2=w_d2, b_d2=b_d2,
    )


def vae_forward_ref(x, eps, p):
    """Pure-JAX reference matching the PyTorch module semantics (f32)."""
    h = jnp.tanh(x @ p["w_e1"] + p["b_e1"])
    mu = h @ p["w_e21"] + p["b_e21"]
    logvar = h @ p["w_e22"] + p["b_e22"]
    std = jnp.exp(0.5 * logvar)
    z = mu + eps * std
    hd = jnp.tanh(z @ p["w_d1"] + p["b_d1"])
    o = hd @ p["w_d2"] + p["b_d2"]
    return jax.nn.softmax(o, axis=1), mu, logvar


if __name__ == "__main__":
    # Small shapes consistent with the module: x is (batch, data_dim).
    batch, data_dim, h_dim, z_dim = 256, 512, 128, 64

    key = jax.random.PRNGKey(0)
    k_params, k_x, k_eps = jax.random.split(key, 3)

    params = init_params(k_params, data_dim, z_dim, h_dim)
    # VAECF feeds non-negative implicit-feedback rows.
    x = jnp.abs(jax.random.normal(k_x, (batch, data_dim), jnp.float32))
    eps = jax.random.normal(k_eps, (batch, z_dim), jnp.float32)

    # ---- f32 path (matches PyTorch semantics) ----
    out, mu, logvar = vae_forward(x, eps, params, block_b=128)
    jax.block_until_ready((out, mu, logvar))

    out_r, mu_r, logvar_r = vae_forward_ref(x, eps, params)
    assert jnp.allclose(mu, mu_r, atol=1e-4, rtol=1e-4)
    assert jnp.allclose(logvar, logvar_r, atol=1e-4, rtol=1e-4)
    # out uses the EUP approximate reciprocal -> slightly looser tolerance.
    assert jnp.allclose(out, out_r, atol=1e-4, rtol=1e-2)
    assert jnp.allclose(jnp.sum(out, axis=1), jnp.ones((batch,)), atol=1e-3)

    # ---- odd batch exercises the padding path ----
    out2, mu2, logvar2 = vae_forward(x[:37], eps[:37], params, block_b=128)
    jax.block_until_ready(out2)
    assert out2.shape == (37, data_dim) and mu2.shape == (37, z_dim)
    assert jnp.allclose(out2, out_r[:37], atol=1e-4, rtol=1e-2)
    assert jnp.allclose(mu2, mu_r[:37], atol=1e-4, rtol=1e-4)

    # ---- bf16 weight storage (halves weight HBM traffic; f32 accumulation) ----
    params_bf16 = {k: (v.astype(jnp.bfloat16) if k.startswith("w_") else v)
                   for k, v in params.items()}
    out_b, mu_b, logvar_b = vae_forward(x, eps, params_bf16, block_b=128)
    jax.block_until_ready((out_b, mu_b, logvar_b))
    assert bool(jnp.all(jnp.isfinite(out_b)))
    assert jnp.allclose(jnp.sum(out_b, axis=1), jnp.ones((batch,)), atol=5e-3)

    print("KERNEL_OK")
</pallas_src>

<mosaic_0001>
module attributes {stable_mosaic.version = 11 : i64} {
  func.func @_vae_fwd_kernel(%arg0: i32, %arg1: memref<128x512xf32, #tpu.memory_space<vmem>>, %arg2: memref<128x64xf32, #tpu.memory_space<vmem>>, %arg3: memref<512x128xf32, #tpu.memory_space<vmem>>, %arg4: memref<1x128xf32, #tpu.memory_space<vmem>>, %arg5: memref<128x128xf32, #tpu.memory_space<vmem>>, %arg6: memref<1x128xf32, #tpu.memory_space<vmem>>, %arg7: memref<64x128xf32, #tpu.memory_space<vmem>>, %arg8: memref<1x128xf32, #tpu.memory_space<vmem>>, %arg9: memref<128x512xf32, #tpu.memory_space<vmem>>, %arg10: memref<1x512xf32, #tpu.memory_space<vmem>>, %arg11: memref<128x512xf32, #tpu.memory_space<vmem>>, %arg12: memref<128x128xf32, #tpu.memory_space<vmem>>) attributes {dimension_semantics = [#tpu.dimension_semantics<parallel>], iteration_bounds = array<i64: 2>, scalar_prefetch = 0 : i64, scratch_operands = 0 : i64, tpu.core_type = #tpu.core_type<tc>, window_params = [{transform_indices = @transform_0, window_bounds = array<i64: 128, 512>}, {transform_indices = @transform_1, window_bounds = array<i64: 128, 64>}, {pipeline_mode = #tpu.pipeline_mode<synchronous>, transform_indices = @transform_2, window_bounds = array<i64: 512, 128>}, {pipeline_mode = #tpu.pipeline_mode<synchronous>, transform_indices = @transform_3, window_bounds = array<i64: 1, 128>}, {pipeline_mode = #tpu.pipeline_mode<synchronous>, transform_indices = @transform_4, window_bounds = array<i64: 128, 128>}, {pipeline_mode = #tpu.pipeline_mode<synchronous>, transform_indices = @transform_5, window_bounds = array<i64: 1, 128>}, {pipeline_mode = #tpu.pipeline_mode<synchronous>, transform_indices = @transform_6, window_bounds = array<i64: 64, 128>}, {pipeline_mode = #tpu.pipeline_mode<synchronous>, transform_indices = @transform_7, window_bounds = array<i64: 1, 128>}, {pipeline_mode = #tpu.pipeline_mode<synchronous>, transform_indices = @transform_8, window_bounds = array<i64: 128, 512>}, {pipeline_mode = #tpu.pipeline_mode<synchronous>, transform_indices = @transform_9, window_bounds = array<i64: 1, 512>}, {transform_indices = @transform_10, window_bounds = array<i64: 128, 512>}, {transform_indices = @transform_11, window_bounds = array<i64: 128, 128>}]} {
    %c0 = arith.constant 0 : index
    %c0_0 = arith.constant 0 : index
    %0 = vector.load %arg1[%c0, %c0_0] : memref<128x512xf32, #tpu.memory_space<vmem>>, vector<128x512xf32>
    %c0_1 = arith.constant 0 : index
    %c0_2 = arith.constant 0 : index
    %1 = vector.load %arg3[%c0_1, %c0_2] : memref<512x128xf32, #tpu.memory_space<vmem>>, vector<512x128xf32>
    %cst = arith.constant dense<0.000000e+00> : vector<128x128xf32>
    %2 = tpu.matmul %0, %1, %cst {dimension_numbers = #tpu.dot_dimension_numbers<[1], [0], [0], [1], [0, 0, 1, 1], [], []>} : vector<128x512xf32>, vector<512x128xf32>, vector<128x128xf32> -> vector<128x128xf32>
    %c0_3 = arith.constant 0 : index
    %c0_4 = arith.constant 0 : index
    %3 = vector.load %arg4[%c0_3, %c0_4] : memref<1x128xf32, #tpu.memory_space<vmem>>, vector<1x128xf32>
    %4 = vector.broadcast %3 : vector<1x128xf32> to vector<128x128xf32>
    %5 = arith.addf %2, %4 : vector<128x128xf32>
    %6 = math.tanh %5 : vector<128x128xf32>
    %c0_5 = arith.constant 0 : index
    %c0_6 = arith.constant 0 : index
    %7 = vector.load %arg5[%c0_5, %c0_6] : memref<128x128xf32, #tpu.memory_space<vmem>>, vector<128x128xf32>
    %cst_7 = arith.constant dense<0.000000e+00> : vector<128x128xf32>
    %8 = tpu.matmul %6, %7, %cst_7 {dimension_numbers = #tpu.dot_dimension_numbers<[1], [0], [0], [1], [0, 0, 1, 1], [], []>} : vector<128x128xf32>, vector<128x128xf32>, vector<128x128xf32> -> vector<128x128xf32>
    %c0_8 = arith.constant 0 : index
    %c0_9 = arith.constant 0 : index
    %9 = vector.load %arg6[%c0_8, %c0_9] : memref<1x128xf32, #tpu.memory_space<vmem>>, vector<1x128xf32>
    %10 = vector.broadcast %9 : vector<1x128xf32> to vector<128x128xf32>
    %11 = arith.addf %8, %10 : vector<128x128xf32>
    %12 = vector.extract_strided_slice %11 {offsets = [0, 0], sizes = [128, 64], strides = [1, 1]} : vector<128x128xf32> to vector<128x64xf32>
    %13 = vector.extract_strided_slice %11 {offsets = [0, 64], sizes = [128, 64], strides = [1, 1]} : vector<128x128xf32> to vector<128x64xf32>
    %cst_10 = arith.constant 5.000000e-01 : f32
    %14 = vector.broadcast %cst_10 : f32 to vector<128x64xf32>
    %15 = arith.mulf %14, %13 : vector<128x64xf32>
    %16 = math.exp %15 : vector<128x64xf32>
    %c0_11 = arith.constant 0 : index
    %c0_12 = arith.constant 0 : index
    %17 = vector.load %arg2[%c0_11, %c0_12] : memref<128x64xf32, #tpu.memory_space<vmem>>, vector<128x64xf32>
    %18 = arith.mulf %17, %16 : vector<128x64xf32>
    %19 = arith.addf %12, %18 : vector<128x64xf32>
    %c0_13 = arith.constant 0 : index
    %c0_14 = arith.constant 0 : index
    %20 = vector.load %arg7[%c0_13, %c0_14] : memref<64x128xf32, #tpu.memory_space<vmem>>, vector<64x128xf32>
    %cst_15 = arith.constant dense<0.000000e+00> : vector<128x128xf32>
    %21 = tpu.matmul %19, %20, %cst_15 {dimension_numbers = #tpu.dot_dimension_numbers<[1], [0], [0], [1], [0, 0, 1, 1], [], []>} : vector<128x64xf32>, vector<64x128xf32>, vector<128x128xf32> -> vector<128x128xf32>
    %c0_16 = arith.constant 0 : index
    %c0_17 = arith.constant 0 : index
    %22 = vector.load %arg8[%c0_16, %c0_17] : memref<1x128xf32, #tpu.memory_space<vmem>>, vector<1x128xf32>
    %23 = vector.broadcast %22 : vector<1x128xf32> to vector<128x128xf32>
    %24 = arith.addf %21, %23 : vector<128x128xf32>
    %25 = math.tanh %24 : vector<128x128xf32>
    %c0_18 = arith.constant 0 : index
    %c0_19 = arith.constant 0 : index
    %26 = vector.load %arg9[%c0_18, %c0_19] : memref<128x512xf32, #tpu.memory_space<vmem>>, vector<128x512xf32>
    %cst_20 = arith.constant dense<0.000000e+00> : vector<128x512xf32>
    %27 = tpu.matmul %25, %26, %cst_20 {dimension_numbers = #tpu.dot_dimension_numbers<[1], [0], [0], [1], [0, 0, 1, 1], [], []>} : vector<128x128xf32>, vector<128x512xf32>, vector<128x512xf32> -> vector<128x512xf32>
    %c0_21 = arith.constant 0 : index
    %c0_22 = arith.constant 0 : index
    %28 = vector.load %arg10[%c0_21, %c0_22] : memref<1x512xf32, #tpu.memory_space<vmem>>, vector<1x512xf32>
    %29 = vector.broadcast %28 : vector<1x512xf32> to vector<128x512xf32>
    %30 = arith.addf %27, %29 : vector<128x512xf32>
    %cst_23 = arith.constant dense<0xFF800000> : vector<128xf32>
    %31 = vector.multi_reduction <maximumf>, %30, %cst_23 [1] : vector<128x512xf32> to vector<128xf32>
    %32 = vector.shape_cast %31 : vector<128xf32> to vector<128x1xf32>
    %33 = vector.broadcast %32 : vector<128x1xf32> to vector<128x512xf32>
    %34 = arith.subf %30, %33 : vector<128x512xf32>
    %35 = math.exp %34 : vector<128x512xf32>
    %cst_24 = arith.constant dense<0.000000e+00> : vector<128xf32>
    %36 = vector.multi_reduction <add>, %35, %cst_24 [1] : vector<128x512xf32> to vector<128xf32>
    %37 = vector.shape_cast %36 : vector<128xf32> to vector<128x1xf32>
    %38 = tpu.reciprocal %37 {approx = true} : vector<128x1xf32> -> vector<128x1xf32>
    %39 = vector.broadcast %38 : vector<128x1xf32> to vector<128x512xf32>
    %40 = arith.mulf %35, %39 : vector<128x512xf32>
    %c0_25 = arith.constant 0 : index
    %c0_26 = arith.constant 0 : index
    %41 = vector.load %arg11[%c0_25, %c0_26] : memref<128x512xf32, #tpu.memory_space<vmem>>, vector<128x512xf32>
    tpu.vector_store %arg11[%c0_25, %c0_26], %40 {strides = array<i32>} : memref<128x512xf32, #tpu.memory_space<vmem>>, vector<128x512xf32>,
    %c0_27 = arith.constant 0 : index
    %c0_28 = arith.constant 0 : index
    %42 = vector.load %arg12[%c0_27, %c0_28] : memref<128x128xf32, #tpu.memory_space<vmem>>, vector<128x128xf32>
    tpu.vector_store %arg12[%c0_27, %c0_28], %11 {strides = array<i32>} : memref<128x128xf32, #tpu.memory_space<vmem>>, vector<128x128xf32>,
    return
  }
  func.func @transform_0(%arg0: i32) -> (i32, i32) {
    %c0_i32 = arith.constant 0 : i32
    %c0_i32_0 = arith.constant 0 : i32
    return %arg0, %c0_i32 : i32, i32
  }
  func.func @transform_1(%arg0: i32) -> (i32, i32) {
    %c0_i32 = arith.constant 0 : i32
    %c0_i32_0 = arith.constant 0 : i32
    return %arg0, %c0_i32 : i32, i32
  }
  func.func @transform_2(%arg0: i32) -> (i32, i32) {
    %c0_i32 = arith.constant 0 : i32
    %c0_i32_0 = arith.constant 0 : i32
    %c0_i32_1 = arith.constant 0 : i32
    return %c0_i32, %c0_i32_0 : i32, i32
  }
  func.func @transform_3(%arg0: i32) -> (i32, i32) {
    %c0_i32 = arith.constant 0 : i32
    %c0_i32_0 = arith.constant 0 : i32
    %c0_i32_1 = arith.constant 0 : i32
    return %c0_i32, %c0_i32_0 : i32, i32
  }
  func.func @transform_4(%arg0: i32) -> (i32, i32) {
    %c0_i32 = arith.constant 0 : i32
    %c0_i32_0 = arith.constant 0 : i32
    %c0_i32_1 = arith.constant 0 : i32
    return %c0_i32, %c0_i32_0 : i32, i32
  }
  func.func @transform_5(%arg0: i32) -> (i32, i32) {
    %c0_i32 = arith.constant 0 : i32
    %c0_i32_0 = arith.constant 0 : i32
    %c0_i32_1 = arith.constant 0 : i32
    return %c0_i32, %c0_i32_0 : i32, i32
  }
  func.func @transform_6(%arg0: i32) -> (i32, i32) {
    %c0_i32 = arith.constant 0 : i32
    %c0_i32_0 = arith.constant 0 : i32
    %c0_i32_1 = arith.constant 0 : i32
    return %c0_i32, %c0_i32_0 : i32, i32
  }
  func.func @transform_7(%arg0: i32) -> (i32, i32) {
    %c0_i32 = arith.constant 0 : i32
    %c0_i32_0 = arith.constant 0 : i32
    %c0_i32_1 = arith.constant 0 : i32
    return %c0_i32, %c0_i32_0 : i32, i32
  }
  func.func @transform_8(%arg0: i32) -> (i32, i32) {
    %c0_i32 = arith.constant 0 : i32
    %c0_i32_0 = arith.constant 0 : i32
    %c0_i32_1 = arith.constant 0 : i32
    return %c0_i32, %c0_i32_0 : i32, i32
  }
  func.func @transform_9(%arg0: i32) -> (i32, i32) {
    %c0_i32 = arith.constant 0 : i32
    %c0_i32_0 = arith.constant 0 : i32
    %c0_i32_1 = arith.constant 0 : i32
    return %c0_i32, %c0_i32_0 : i32, i32
  }
  func.func @transform_10(%arg0: i32) -> (i32, i32) {
    %c0_i32 = arith.constant 0 : i32
    %c0_i32_0 = arith.constant 0 : i32
    return %arg0, %c0_i32 : i32, i32
  }
  func.func @transform_11(%arg0: i32) -> (i32, i32) {
    %c0_i32 = arith.constant 0 : i32
    %c0_i32_0 = arith.constant 0 : i32
    return %arg0, %c0_i32 : i32, i32
  }
}

</mosaic_0001>

<bundles_post_ra>
// kernel: tpu_custom_call.1
= control target key start
LH: loop header
LB: loop body
LE: loop exit
PB: predicated region body
PF: predicated region fallthrough
CT: control target
= control target key end

     0   :  { %s5015_s0 = inlined_call_operand.hbm [shape: f32[256,512], index: 0, kind: input, shape index: {}]   ;;  %s5016_s1 = inlined_call_operand.vmem [shape: f32[256,64], index: 1, kind: input, shape index: {}]   ;;  %s5017_s2 = inlined_call_operand.hbm [shape: f32[512,128], index: 2, kind: input, shape index: {}]   ;;  %s5018_s3 = inlined_call_operand.vmem [shape: f32[1,128], index: 3, kind: input, shape index: {}]   ;;  %s5019_s4 = inlined_call_operand.vmem [shape: f32[128,128], index: 4, kind: input, shape index: {}]   ;;  %s5020_s5 = inlined_call_operand.vmem [shape: f32[1,128], index: 5, kind: input, shape index: {}]   ;;  %s5021_s6 = inlined_call_operand.vmem [shape: f32[64,128], index: 6, kind: input, shape index: {}]   ;;  %s5022_s7 = inlined_call_operand.vmem [shape: f32[1,128], index: 7, kind: input, shape index: {}]   ;;  %s5023_s8 = inlined_call_operand.hbm [shape: f32[128,512], index: 8, kind: input, shape index: {}]   ;;  %s5024_s9 = inlined_call_operand.vmem [shape: f32[1,512], index: 9, kind: input, shape index: {}]   ;;  %s5025_s10 = inlined_call_operand.hbm [shape: f32[256,512], index: 10, kind: output, shape index: {0}]   ;;  %s5026_s11 = inlined_call_operand.hbm [shape: f32[256,128], index: 11, kind: output, shape index: {1}]  }
   0x1   :  { %5058 = sst [smem:[#allocation31_spill]] %s5025_s10 }
   0x2   :  { %17 = vsyncpa [#allocation3], 0 }
   0x3   :  { %19 = vsyncpa [#allocation3 + $0x1], 0 }
   0x4   :  { %20 = vsyncpa [#allocation6], 0 }
   0x5   :  { %21 = vsyncpa [#allocation4], 0 }
   0x6   :  { %23 = vsyncpa [#allocation4 + $0x1], 0 }
   0x7   :  { %24 = vsyncpa [#allocation10], 0 }
   0x8   :  { %26 = vsyncpa [#allocation10 + $0x1], 0  ;;  %s3698_s17 = smov 0   ;;  %s3700_s18 = smov 0  }
   0x9   :  { %s3702_s19 = smov 0   ;;  %s3704_s20 = smov 0  }
   0xa LB: > { %5059 = sst [smem:[#allocation15_spill]] %s3609_s17  ;;  %s3719_s21 = sadd.s32 4294967295, %s3621_s20   ;;  %s3621_s20 = sphi %s3704_s20, %s5128_s20   ;;  %s3617_s19 = sphi %s3702_s19, %s5127_s19   ;;  %s3613_s18 = sphi %s3700_s18, %s5126_s18   ;;  %s3609_s17 = sphi %s3698_s17, %s5125_s17  }
   0xb   : > { %s2557_s22 = sadd.s32 4294967294, %s3621_s20   ;;  %p52_p0 = scmp.ne.s32.totalorder %s3613_s18, %s3609_s17 }
   0xc   : > { %p5027_p1 = scmp.eq.s32.totalorder %s3719_s21, 0  ;;  %p276_p3 = scmp.eq.s32.totalorder %s2557_s22, 1 }
   0xd   : > { %p2558_p5 = scmp.ge.s32.totalorder %s3621_s20, 1  ;;  %p309_p7 = scmp.lt.s32.totalorder %s3621_s20, 3 }
   0xe   : > { %p3728_p4 = por %p5027_p1, %p52_p0  ;;  %p3733_p6 = por %p276_p3, %p52_p0 }
   0xf   : > { %p3738_p8 = pnand %p2558_p5, %p309_p7  ;;  %s3623_s26 = smov [#allocation5]  }
  0x10   : > { %s5060_s23 = scalar_select %p3728_p4, 1, 0 }
  0x11   : > { %s5061_s24 = scalar_select %p3733_p6, 1, 0 }
  0x12   : > { %s321_s27 = sshll.u32 %s3623_s26, 4  ;;  %p3109_p9 = pneg %p3738_p8  ;;  %s3742_s27 = int_to_ptr.vmem [resolvable:$true] %s321_s27 }
  0x13   : > { %5062 = sst [smem:[#allocation16_spill]] %s5061_s24  ;;  %s3624_s29 = smov [#allocation7]  }
  0x14   : > { %p3749_p11 = pnand %p3109_p9, %p5027_p1  ;;  %s349_s30 = sshll.u32 %s3624_s29, 4  ;;  %s3753_s30 = int_to_ptr.vmem [resolvable:$true] %s349_s30 }
  0x15   : > { %s3433_s14 = scalar_lea.hbm %s5017_s2, 8192 }
  0x16   : > { %p3434_p12 = scmp.ne.s32.totalorder %s5017_s2, %s3433_s14  ;;  %p3435_p13 = pneg %p3749_p11 }
  0x17   : > { %p3440_p5 = scmp.lt.u32.totalorder %s3433_s14, %s5017_s2 }
  0x18   : > { %p3436_p0 = pnand %p3435_p13, %p3434_p12 }
  0x1a   : > { %p3437_p3 = pneg %p3436_p0 }
  0x1c   : > { %p3442_p7 = pnand %p3440_p5, %p3437_p3 }
  0x1e   : > { %3445 = shalt.err (!%p3442_p7)
}
  0x1f   : > { %s3446_s29 = scalar_lea.vmem %s3742_s27, 8192  ;;  %p3454_p2 = scmp.lt.s32.totalorder %s3742_s27, %s3742_s27 }
  0x20   : > { %p3447_p9 = scmp.ne.s32.totalorder %s3742_s27, %s3446_s29  ;;  %p3455_p12 = scmp.lt.s32.totalorder %s3446_s29, %s3446_s29 }
  0x22   : > { %p3449_p10 = pnand %p3447_p9, %p3435_p13  ;;  %p3456_p0 = por %p3455_p12, %p3454_p2 }
  0x24   : > { %p3450_p1 = pneg %p3449_p10 }
  0x26   : > { %p3457_p6 = pnand %p3456_p0, %p3450_p1 }
  0x28   : > { %3460 = shalt.err (!%p3457_p6)
}
  0x29   : > { %s3625_s12 = smov 128   ;;  %s3626_s13 = smov 8  }
  0x2a   : > { %3112 = dma.hbm_to_vmem [thread:$0]  (!%p3749_p11), %s5017_s2, 8192, %s3742_s27, [#allocation6], %s3625_s12, %s3625_s12, %s3626_s13  }
  0x2b   : > { %s3461_s26 = scalar_lea.hbm %s5023_s8, 8192 }
  0x2c   : > { %p3462_p2 = scmp.ne.s32.totalorder %s5023_s8, %s3461_s26  ;;  %p3468_p10 = scmp.lt.u32.totalorder %s3461_s26, %s5023_s8 }
  0x2e   : > { %p3464_p1 = pnand %p3462_p2, %p3435_p13 }
  0x30   : > { %p3465_p6 = pneg %p3464_p1 }
  0x32   : > { %p3470_p3 = pnand %p3468_p10, %p3465_p6 }
  0x34   : > { %3473 = shalt.err (!%p3470_p3)
}
  0x35   : > { %s3474_s27 = scalar_lea.vmem %s3753_s30, 8192  ;;  %p3482_p12 = scmp.lt.s32.totalorder %s3753_s30, %s3753_s30 }
  0x36   : > { %p3475_p5 = scmp.ne.s32.totalorder %s3753_s30, %s3474_s27  ;;  %p3483_p0 = scmp.lt.s32.totalorder %s3474_s27, %s3474_s27 }
  0x38   : > { %p3477_p7 = pnand %p3475_p5, %p3435_p13  ;;  %p3484_p2 = por %p3483_p0, %p3482_p12 }
  0x3a   : > { %p3478_p9 = pneg %p3477_p7 }
  0x3c   : > { %p3485_p1 = pnand %p3484_p2, %p3478_p9 }
  0x3e   : > { %3488 = shalt.err (!%p3485_p1)
}
  0x3f   : > { %s5031_s10 = smov 512   ;;  %s5032_s17 = smov 32  }
  0x40   : > { %3115 = dma.hbm_to_vmem [thread:$0]  (!%p3749_p11), %s5023_s8, 8192, %s3753_s30, [#allocation6], %s5031_s10, %s5031_s10, %s5032_s17  }
  0x41   : > { %s3811_s13 = sadd.s32 1, %s3621_s20   ;;  %s39_s15 = sadd.s32 1, %s3617_s19 }
  0x42   : > { %s36_s14 = ssub.s32 %s3621_s20, %s3811_s13  ;;  %p46_p6 = scmp.ne.s32.totalorder %s3617_s19, %s3613_s18 }
  0x43   : > { %p37_p13 = scmp.eq.s32.totalorder %s36_s14, 0  ;;  %p47_p10 = scmp.eq.s32.totalorder %s3621_s20, 0 }
  0x44   : > { %p5065_p5 = scmp.eq.s32.totalorder %s3719_s21, 1  ;;  %p3129_p9 = scmp.lt.s32.totalorder %s3621_s20, 2 }
  0x45   : > { %s3820_s16 = scalar_select %p37_p13, %s3617_s19, %s39_s15  }
  0x46   : > { %p48_p3 = por %p47_p10, %p46_p6  ;;  %p3824_p7 = por %p5065_p5, %p46_p6 }
  0x47   : > { %s366_s22 = sand.u32 1, %s3617_s19   ;;  %s2603_s30 = sshll.u32 %s3621_s20, 13 }
  0x48   : > { %s5066_s28 = scalar_select %p3824_p7, 1, 0 }
  0x49   : > { %s2562_s26 = sshll.u32 %s366_s22, 9  ;;  %s3834_s24 = scalar_lea.hbm %s5015_s0, %s2603_s30 }
  0x4a   : > { %s370_s12 = scalar_lea.vmem [#allocation2], %s2562_s26  ;;  %p3838_p11 = pnand %p3129_p9, %p48_p3 }
  0x4b   : > { %s378_s14 = sshll.u32 %s370_s12, 4  ;;  %s3842_s10 = scalar_lea.sflag [#allocation3], %s366_s22  ;;  %s3836_s14 = int_to_ptr.vmem [resolvable:$true] %s378_s14 }
  0x4c   : > { %s3489_s17 = scalar_lea.hbm %s3834_s24, 8192  ;;  %p3491_p0 = pneg %p3838_p11 }
  0x4d   : > { %p3490_p12 = scmp.ne.s32.totalorder %s3834_s24, %s3489_s17  ;;  %s3494_s29 = scalar_lea.hbm %s5015_s0, 16384 }
  0x4e   : > { %p3495_p13 = scmp.lt.u32.totalorder %s3834_s24, %s5015_s0  ;;  %p3496_p6 = scmp.lt.u32.totalorder %s3494_s29, %s3489_s17 }
  0x4f   : > { %p3492_p2 = pnand %p3491_p0, %p3490_p12  ;;  %p3498_p3 = scmp.lt.u32.totalorder %s3489_s17, %s3834_s24 }
  0x50   : > { %p3497_p10 = por %p3496_p6, %p3495_p13 }
  0x51   : > { %p3493_p1 = pneg %p3492_p2 }
  0x52   : > { %p3499_p5 = por %p3498_p3, %p3497_p10 }
  0x54   : > { %p3500_p9 = pnand %p3499_p5, %p3493_p1 }
  0x56   : > { %3503 = shalt.err (!%p3500_p9)
}
  0x57   : > { %s3504_s22 = scalar_lea.vmem %s3836_s14, 8192  ;;  %s3629_s26 = smov [#allocation2]  }
  0x58   : > { %p3505_p12 = scmp.ne.s32.totalorder %s3836_s14, %s3504_s22  ;;  %s3509_s30 = sshll.u32 %s3629_s26, 4  ;;  %s3510_s30 = int_to_ptr.vmem [resolvable:$false] %s3509_s30 }
  0x59   : > { %s3511_s27 = scalar_lea.vmem %s3510_s30, 16384  ;;  %p3512_p4 = scmp.lt.s32.totalorder %s3836_s14, %s3510_s30 }
  0x5a   : > { %p3507_p2 = pnand %p3505_p12, %p3491_p0  ;;  %p3513_p13 = scmp.lt.s32.totalorder %s3511_s27, %s3504_s22 }
  0x5c   : > { %p3508_p7 = pneg %p3507_p2  ;;  %p3514_p6 = por %p3513_p13, %p3512_p4 }
  0x5e   : > { %p3515_p10 = pnand %p3514_p6, %p3508_p7 }
  0x60   : > { %3518 = shalt.err (!%p3515_p10)
}
  0x61   : > { %s5068_s17 = smov 32   ;;  %s5069_s29 = smov 512  }
  0x62   : > { %3119 = dma.hbm_to_vmem [thread:$0]  (!%p3838_p11), %s3834_s24, 8192, %s3836_s14, %s3842_s10, %s5069_s29, %s5069_s29, %s5068_s17  }
  0x63   : > { %399 = sbr.rel (%p3738_p8) target bundleno = 1578 (0x62a), region = 60 }
  0x6a   : > { %s3876_s12 = sand.u32 1, %s3613_s18   ;;  %p5070_p4 = scmp.ne.s32.totalorder %s5060_s23, 0 }
  0x6b   : > { %s2567_s22 = sshll.u32 %s3876_s12, 9  ;;  %s402_s26 = scalar_lea.sflag [#allocation3], %s3876_s12 }
  0x6c   : > { %s3882_s15 = scalar_lea.vmem [#allocation2], %s2567_s22 }
  0x6d   : > { %3592 = dma.done.wait (%p5070_p4), %s402_s26, 8192  }
  0x6e   : > { %3594 = vsyncadd (%p5070_p4), %s402_s26, 4294959104  ;;  %p5071_p7 = scmp.eq.s32.totalorder %s3719_s21, 0 }
  0x70   : > { %3596 = dma.done.wait (%p5071_p7), [#allocation6], 16384   ;;  %p5072_p8 = pmov %p5071_p7 }
  0x71   : > { %v551_v0 = vld [vmem:[#allocation5 + $0x80] sm:$0xff]  ;;  %v552_v1 = vld [vmem:[#allocation5 + $0x88] sm:$0xff]  ;;  %v553_v11 = vld [vmem:[#allocation5 + $0x90] sm:$0xff]  ;;  %s2571_s29 = sshll.u32 %s3876_s12, 7  ;;  %s2572_s10 = sshll.u32 %s3719_s21, 4  ;;  %vm1255_vm0 = vcmask 523264  }
  0x72   : > { %3598 = vsyncadd (%p5072_p8), [#allocation6], 4294950912  ;;  %v535_v2 = vld [vmem:[#allocation5] sm:$0xff]  ;;  %v2919_v3 = vpack.c.bf16 %v552_v1, %v551_v0  ;;  %v536_v4 = vld [vmem:[#allocation5 + $0x8] sm:$0xff]  ;;  %s4061_s25 = scalar_lea.vmem [#allocation9], %s2571_s29  ;;  %p464_p11 = scmp.lt.s32.totalorder %s2572_s10, 31 }
  0x73   : > { %v583_v5 = vld [vmem:[#allocation5 + $0x180] sm:$0xff]  ;;  %v584_v6 = vld [vmem:[#allocation5 + $0x188] sm:$0xff]  ;;  %v2921_v7 = vpack.c.bf16 %v536_v4, %v535_v2  ;;  %v554_v13 = vld [vmem:[#allocation5 + $0x98] sm:$0xff]  ;;  %p5110_p1 = scmp.ne.s32.totalorder %s5066_s28, 0  ;;  %s3632_s29 = smov [#allocation9]  }
  0x74   : > { %v2951_v8 = vpack.c.bf16 %v584_v6, %v583_v5  ;;  %v567_v9 = vld [vmem:[#allocation5 + $0x100] sm:$0xff]  ;;  %v568_v10 = vld [vmem:[#allocation5 + $0x108] sm:$0xff]  ;;  %2920 = vmatprep.subr.bf16.mxu0 %v2919_v3  ;;  %v537_v14 = vld [vmem:[#allocation5 + $0x10] sm:$0xff]  ;;  %v2923_v16 = vpack.c.bf16 %v554_v13, %v553_v11  ;;  %s5130_s10 = smov (!%p464_p11, %s2572_s10), 31  ;;  %s3523_s26 = sshll.u32 %s3632_s29, 4  ;;  %s3524_s26 = int_to_ptr.vmem [resolvable:$false] %s3523_s26 }
  0x75   : > { %v2953_v12 = vpack.c.bf16 %v568_v10, %v567_v9  ;;  %v538_v15 = vld [vmem:[#allocation5 + $0x18] sm:$0xff]  ;;  %2922 = vmatpush3.bf16.msra.mxu0 %v2921_v7  ;;  %v585_v18 = vld [vmem:[#allocation5 + $0x190] sm:$0xff]  ;;  %v555_v23 = vld [vmem:[#allocation5 + $0xa0] sm:$0xff]  ;;  %s2573_s24 = sshll.u32 %s5130_s10, 3  ;;  %s2421_s10 = sshll.u32 %s4061_s25, 4  ;;  %s4806_s10 = int_to_ptr.vmem [resolvable:$true] %s2421_s10 }
  0x76   : > { %2952 = vmatprep.subr.bf16.mxu1 %v2951_v8  ;;  %v2925_v17 = vpack.c.bf16 %v538_v15, %v537_v14  ;;  %v586_v19 = vld [vmem:[#allocation5 + $0x198] sm:$0xff]  ;;  %v569_v20 = vld [vmem:[#allocation5 + $0x110] sm:$0xff]  ;;  %v556_v24 = vld [vmem:[#allocation5 + $0xa8] sm:$0xff]  ;;  %2924 = vmatprep.subr.bf16.mxu0 %v2923_v16  ;;  %s4173_s27 = scalar_lea.vmem %s5016_s1, %s2573_s24  ;;  %s3519_s17 = scalar_lea.vmem %s4806_s10, 2048 }
  0x77   : > { %2954 = vmatpush3.bf16.msra.mxu1 %v2953_v12  ;;  %v2955_v21 = vpack.c.bf16 %v586_v19, %v585_v18  ;;  %v570_v22 = vld [vmem:[#allocation5 + $0x118] sm:$0xff]  ;;  %v2927_v26 = vpack.c.bf16 %v556_v24, %v555_v23  ;;  %v539_v27 = vld [vmem:[#allocation5 + $0x20] sm:$0xff]  ;;  %v540_v28 = vld [vmem:[#allocation5 + $0x28] sm:$0xff]  ;;  %p3520_p0 = scmp.ne.s32.totalorder %s4806_s10, %s3519_s17  ;;  %p3526_p9 = scmp.lt.s32.totalorder %s4806_s10, %s3524_s26 }
  0x78   : > { %v2957_v25 = vpack.c.bf16 %v570_v22, %v569_v20  ;;  %v587_v29 = vld [vmem:[#allocation5 + $0x1a0] sm:$0xff]  ;;  %v588_v30 = vld [vmem:[#allocation5 + $0x1a8] sm:$0xff]  ;;  %v2929_v33 = vpack.c.bf16 %v540_v28, %v539_v27  ;;  %v557_v35 = vld [vmem:[#allocation5 + $0xb0] sm:$0xff] }
  0x79   : > { %2956 = vmatprep.subr.bf16.mxu1 %v2955_v21  ;;  %v571_v31 = vld [vmem:[#allocation5 + $0x120] sm:$0xff]  ;;  %v572_v32 = vld [vmem:[#allocation5 + $0x128] sm:$0xff]  ;;  %2926 = vmatpush3.bf16.msra.mxu0 %v2925_v17  ;;  %v2959_v34 = vpack.c.bf16 %v588_v30, %v587_v29  ;;  %v558_v36 = vld [vmem:[#allocation5 + $0xb8] sm:$0xff]  ;;  %p3521_p3 = pnand %p3520_p0, %p5110_p1 }
  0x7a   : > { %v541_v37 = vld [vmem:[#allocation5 + $0x30] sm:$0xff]  ;;  %2928 = vmatprep.subr.bf16.mxu0 %v2927_v26  ;;  %v2961_v38 = vpack.c.bf16 %v572_v32, %v571_v31  ;;  %v2931_v39 = vpack.c.bf16 %v558_v36, %v557_v35  ;;  %v542_v40 = vld [vmem:[#allocation5 + $0x38] sm:$0xff]  ;;  %v559_v46 = vld [vmem:[#allocation5 + $0xc0] sm:$0xff] }
  0x7b   : > { %2958 = vmatpush3.bf16.msra.mxu1 %v2957_v25  ;;  %v589_v41 = vld [vmem:[#allocation5 + $0x1b0] sm:$0xff]  ;;  %v590_v42 = vld [vmem:[#allocation5 + $0x1b8] sm:$0xff]  ;;  %v560_v47 = vld [vmem:[#allocation5 + $0xc8] sm:$0xff]  ;;  %v2933_v48 = vpack.c.bf16 %v542_v40, %v541_v37  ;;  %p3522_p5 = pneg %p3521_p3 }
  0x7c   : > { %2960 = vmatprep.subr.bf16.mxu1 %v2959_v34  ;;  %v2963_v43 = vpack.c.bf16 %v590_v42, %v589_v41  ;;  %v573_v44 = vld [vmem:[#allocation5 + $0x130] sm:$0xff]  ;;  %v574_v45 = vld [vmem:[#allocation5 + $0x138] sm:$0xff]  ;;  %v591_v49 = vld [vmem:[#allocation5 + $0x1c0] sm:$0xff]  ;;  %v2935_v52 = vpack.c.bf16 %v560_v47, %v559_v46 }
  0x7d   : > { %2930 = vmatpush3.bf16.msra.mxu0 %v2929_v33  ;;  %v592_v50 = vld [vmem:[#allocation5 + $0x1c8] sm:$0xff]  ;;  %v2965_v51 = vpack.c.bf16 %v574_v45, %v573_v44  ;;  %v543_v53 = vld [vmem:[#allocation5 + $0x40] sm:$0xff]  ;;  %v561_v58 = vld [vmem:[#allocation5 + $0xd0] sm:$0xff] }
  0x7e   : > { %2932 = vmatprep.subr.bf16.mxu0 %v2931_v39  ;;  %v544_v54 = vld [vmem:[#allocation5 + $0x48] sm:$0xff]  ;;  %v575_v55 = vld [vmem:[#allocation5 + $0x140] sm:$0xff]  ;;  %v2967_v56 = vpack.c.bf16 %v592_v50, %v591_v49  ;;  %v562_v59 = vld [vmem:[#allocation5 + $0xd8] sm:$0xff] }
  0x7f   : > { %2962 = vmatpush3.bf16.msra.mxu1 %v2961_v38  ;;  %v576_v57 = vld [vmem:[#allocation5 + $0x148] sm:$0xff]  ;;  %v593_v60 = vld [vmem:[#allocation5 + $0x1d0] sm:$0xff]  ;;  %v594_v61 = vld [vmem:[#allocation5 + $0x1d8] sm:$0xff]  ;;  %v2937_v62 = vpack.c.bf16 %v544_v54, %v543_v53  ;;  %v2939_v0 = vpack.c.bf16 %v562_v59, %v561_v58 }
  0x80   : > { %2964 = vmatprep.subr.bf16.mxu1 %v2963_v43  ;;  %v2969_v63 = vpack.c.bf16 %v576_v57, %v575_v55  ;;  %v545_v1 = vld [vmem:[#allocation5 + $0x50] sm:$0xff]  ;;  %v546_v2 = vld [vmem:[#allocation5 + $0x58] sm:$0xff]  ;;  %v2971_v4 = vpack.c.bf16 %v594_v61, %v593_v60  ;;  %v563_v6 = vld [vmem:[#allocation5 + $0xe0] sm:$0xff] }
  0x81   : > { %2934 = vmatpush3.bf16.msra.mxu0 %v2933_v48  ;;  %v577_v3 = vld [vmem:[#allocation5 + $0x150] sm:$0xff]  ;;  %v578_v5 = vld [vmem:[#allocation5 + $0x158] sm:$0xff]  ;;  %v564_v7 = vld [vmem:[#allocation5 + $0xe8] sm:$0xff]  ;;  %v2941_v10 = vpack.c.bf16 %v546_v2, %v545_v1 }
  0x82   : > { %2936 = vmatprep.subr.bf16.mxu0 %v2935_v52  ;;  %v595_v8 = vld [vmem:[#allocation5 + $0x1e0] sm:$0xff]  ;;  %v596_v9 = vld [vmem:[#allocation5 + $0x1e8] sm:$0xff]  ;;  %v2973_v13 = vpack.c.bf16 %v578_v5, %v577_v3  ;;  %v2943_v14 = vpack.c.bf16 %v564_v7, %v563_v6  ;;  %v565_v19 = vld [vmem:[#allocation5 + $0xf0] sm:$0xff] }
  0x83   : > { %2966 = vmatpush3.bf16.msra.mxu1 %v2965_v51  ;;  %v547_v11 = vld [vmem:[#allocation5 + $0x60] sm:$0xff]  ;;  %v548_v12 = vld [vmem:[#allocation5 + $0x68] sm:$0xff]  ;;  %v2975_v18 = vpack.c.bf16 %v596_v9, %v595_v8  ;;  %v566_v20 = vld [vmem:[#allocation5 + $0xf8] sm:$0xff] }
  0x84   : > { %2968 = vmatprep.subr.bf16.mxu1 %v2967_v56  ;;  %v579_v15 = vld [vmem:[#allocation5 + $0x160] sm:$0xff]  ;;  %v580_v16 = vld [vmem:[#allocation5 + $0x168] sm:$0xff]  ;;  %v474_v21 = vld [vmem:[%s3882_s15 + $0x18] sm:$0xff]  ;;  %v2945_v24 = vpack.c.bf16 %v548_v12, %v547_v11  ;;  %v2947_v26 = vpack.c.bf16 %v566_v20, %v565_v19 }
  0x85   : > { %2938 = vmatpush3.bf16.msra.mxu0 %v2937_v62  ;;  %v472_v17 = vld [vmem:[%s3882_s15 + $0x8] sm:$0xff]  ;;  %v597_v22 = vld [vmem:[#allocation5 + $0x1f0] sm:$0xff]  ;;  %v598_v23 = vld [vmem:[#allocation5 + $0x1f8] sm:$0xff]  ;;  %815 = vmatprep.mubr.f32.mxu1 %v474_v21  ;;  %v2977_v25 = vpack.c.bf16 %v580_v16, %v579_v15 }
  0x86   : > { %2940 = vmatprep.subr.bf16.mxu0 %v2939_v0  ;;  %670 = vmatprep.mubr.f32.mxu0 %v472_v17  ;;  %v549_v27 = vld [vmem:[#allocation5 + $0x70] sm:$0xff]  ;;  %v550_v28 = vld [vmem:[#allocation5 + $0x78] sm:$0xff]  ;;  %v2979_v29 = vpack.c.bf16 %v598_v23, %v597_v22  ;;  %v471_v34 = vld [vmem:[%s3882_s15] sm:$0xff] }
  0x87   : > { %2970 = vmatpush3.bf16.msra.mxu1 %v2969_v63  ;;  %v581_v30 = vld [vmem:[#allocation5 + $0x170] sm:$0xff]  ;;  %v582_v31 = vld [vmem:[#allocation5 + $0x178] sm:$0xff]  ;;  %v2949_v32 = vpack.c.bf16 %v550_v28, %v549_v27  ;;  %v476_v36 = vld [vmem:[%s3882_s15 + $0x28] sm:$0xff] }
  0x88   : > { %2972 = vmatprep.subr.bf16.mxu1 %v2971_v4  ;;  %v2981_v33 = vpack.c.bf16 %v582_v31, %v581_v30  ;;  %v473_v35 = vld [vmem:[%s3882_s15 + $0x10] sm:$0xff]  ;;  %v478_v37 = vld [vmem:[%s3882_s15 + $0x38] sm:$0xff]  ;;  %v475_v38 = vld [vmem:[%s3882_s15 + $0x20] sm:$0xff] }
  0x89   : > { %2942 = vmatpush3.bf16.msra.mxu0 %v2941_v10  ;;  %v477_v39 = vld [vmem:[%s3882_s15 + $0x30] sm:$0xff]  ;;  %v480_v40 = vld [vmem:[%s3882_s15 + $0x48] sm:$0xff]  ;;  %v482_v41 = vld [vmem:[%s3882_s15 + $0x58] sm:$0xff] }
  0x8a   : > { %2944 = vmatprep.subr.bf16.mxu0 %v2943_v14  ;;  %v479_v42 = vld [vmem:[%s3882_s15 + $0x40] sm:$0xff]  ;;  %v481_v43 = vld [vmem:[%s3882_s15 + $0x50] sm:$0xff]  ;;  %v484_v44 = vld [vmem:[%s3882_s15 + $0x68] sm:$0xff] }
  0x8b   : > { %2974 = vmatpush3.bf16.msra.mxu1 %v2973_v13  ;;  %v486_v45 = vld [vmem:[%s3882_s15 + $0x78] sm:$0xff]  ;;  %v912_v46 = vld [vmem:[%s5019_s4] sm:$0xff]  ;;  %v913_v47 = vld [vmem:[%s5019_s4 + $0x8] sm:$0xff] }
  0x8c   : > { %2976 = vmatprep.subr.bf16.mxu1 %v2975_v18  ;;  %v914_v48 = vld [vmem:[%s5019_s4 + $0x10] sm:$0xff]  ;;  %v915_v49 = vld [vmem:[%s5019_s4 + $0x18] sm:$0xff]  ;;  %v483_v50 = vld [vmem:[%s3882_s15 + $0x60] sm:$0xff]  ;;  %v2983_v51 = vpack.c.bf16 %v913_v47, %v912_v46 }
  0x8d   : > { %2946 = vmatpush3.bf16.msra.mxu0 %v2945_v24  ;;  %v485_v52 = vld [vmem:[%s3882_s15 + $0x70] sm:$0xff]  ;;  %v488_v53 = vld [vmem:[%s3882_s15 + $0x88] sm:$0xff]  ;;  %v490_v54 = vld [vmem:[%s3882_s15 + $0x98] sm:$0xff]  ;;  %v2987_v55 = vpack.c.bf16 %v915_v49, %v914_v48 }
  0x8e   : > { %2948 = vmatprep.subr.bf16.mxu0 %v2947_v26  ;;  %v916_v56 = vld [vmem:[%s5019_s4 + $0x20] sm:$0xff]  ;;  %v917_v57 = vld [vmem:[%s5019_s4 + $0x28] sm:$0xff]  ;;  %v489_v59 = vld [vmem:[%s3882_s15 + $0x90] sm:$0xff] }
  0x8f   : > { %2978 = vmatpush3.bf16.msra.mxu1 %v2977_v25  ;;  %v487_v58 = vld [vmem:[%s3882_s15 + $0x80] sm:$0xff]  ;;  %v492_v60 = vld [vmem:[%s3882_s15 + $0xa8] sm:$0xff]  ;;  %v494_v61 = vld [vmem:[%s3882_s15 + $0xb8] sm:$0xff]  ;;  %v2991_v62 = vpack.c.bf16 %v917_v57, %v916_v56 }
  0x90   : > { %2980 = vmatprep.subr.bf16.mxu1 %v2979_v29  ;;  %v918_v63 = vld [vmem:[%s5019_s4 + $0x30] sm:$0xff]  ;;  %v919_v0 = vld [vmem:[%s5019_s4 + $0x38] sm:$0xff]  ;;  %v491_v1 = vld [vmem:[%s3882_s15 + $0xa0] sm:$0xff] }
  0x91   : > { %2950 = vmatpush3.bf16.msra.mxu0 %v2949_v32  ;;  %v493_v2 = vld [vmem:[%s3882_s15 + $0xb0] sm:$0xff]  ;;  %v496_v3 = vld [vmem:[%s3882_s15 + $0xc8] sm:$0xff]  ;;  %v498_v4 = vld [vmem:[%s3882_s15 + $0xd8] sm:$0xff]  ;;  %v2995_v5 = vpack.c.bf16 %v919_v0, %v918_v63 }
  0x92   : > { %2984 = vmatprep.subr.bf16.mxu0 %v2983_v51  ;;  %v920_v6 = vld [vmem:[%s5019_s4 + $0x40] sm:$0xff]  ;;  %v921_v7 = vld [vmem:[%s5019_s4 + $0x48] sm:$0xff]  ;;  %v497_v9 = vld [vmem:[%s3882_s15 + $0xd0] sm:$0xff] }
  0x93   : > { %2982 = vmatpush3.bf16.msra.mxu1 %v2981_v33  ;;  %v495_v8 = vld [vmem:[%s3882_s15 + $0xc0] sm:$0xff]  ;;  %v500_v10 = vld [vmem:[%s3882_s15 + $0xe8] sm:$0xff]  ;;  %v502_v11 = vld [vmem:[%s3882_s15 + $0xf8] sm:$0xff]  ;;  %v2999_v12 = vpack.c.bf16 %v921_v7, %v920_v6 }
  0x94   : > { %671 = vmatmul.mubr.f32.vlgmr.msra.gmra.mrb[0].mxu0 %v471_v34  ;;  %v922_v13 = vld [vmem:[%s5019_s4 + $0x50] sm:$0xff]  ;;  %v923_v14 = vld [vmem:[%s5019_s4 + $0x58] sm:$0xff]  ;;  %v499_v15 = vld [vmem:[%s3882_s15 + $0xe0] sm:$0xff] }
  0x95   : > { %675 = vmatprep.mubr.f32.mxu0 %v476_v36  ;;  %2986 = vmatpush3.bf16.msra.mxu0 %v2983_v51  ;;  %v501_v16 = vld [vmem:[%s3882_s15 + $0xf0] sm:$0xff]  ;;  %v504_v17 = vld [vmem:[%s3882_s15 + $0x108] sm:$0xff]  ;;  %v506_v18 = vld [vmem:[%s3882_s15 + $0x118] sm:$0xff]  ;;  %v3003_v19 = vpack.c.bf16 %v923_v14, %v922_v13 }
  0x96   : > { %816 = vmatmul.mubr.f32.vlgmr.msra.gmra.mrb[0].mxu1 %v473_v35  ;;  %2988 = vmatprep.subr.bf16.mxu0 %v2987_v55  ;;  %v503_v20 = vld [vmem:[%s3882_s15 + $0x100] sm:$0xff]  ;;  %v505_v21 = vld [vmem:[%s3882_s15 + $0x110] sm:$0xff]  ;;  %v508_v22 = vld [vmem:[%s3882_s15 + $0x128] sm:$0xff] }
  0x97   : > { %820 = vmatprep.mubr.f32.mxu1 %v478_v37  ;;  %v510_v23 = vld [vmem:[%s3882_s15 + $0x138] sm:$0xff]  ;;  %v507_v24 = vld [vmem:[%s3882_s15 + $0x120] sm:$0xff]  ;;  %v509_v25 = vld [vmem:[%s3882_s15 + $0x130] sm:$0xff] }
  0x98   : > { %676 = vmatmul.mubr.f32.gmra.mrb[2].mxu0 %v475_v38  ;;  %v512_v26 = vld [vmem:[%s3882_s15 + $0x148] sm:$0xff]  ;;  %v514_v27 = vld [vmem:[%s3882_s15 + $0x158] sm:$0xff]  ;;  %v511_v28 = vld [vmem:[%s3882_s15 + $0x140] sm:$0xff] }
  0x99   : > { %680 = vmatprep.mubr.f32.mxu0 %v480_v40  ;;  %2990 = vmatpush3.bf16.msra.mxu0 %v2987_v55  ;;  %v513_v29 = vld [vmem:[%s3882_s15 + $0x150] sm:$0xff]  ;;  %v516_v30 = vld [vmem:[%s3882_s15 + $0x168] sm:$0xff]  ;;  %v518_v31 = vld [vmem:[%s3882_s15 + $0x178] sm:$0xff] }
  0x9a   : > { %821 = vmatmul.mubr.f32.gmra.mrb[2].mxu1 %v477_v39  ;;  %2992 = vmatprep.subr.bf16.mxu0 %v2991_v62  ;;  %v515_v32 = vld [vmem:[%s3882_s15 + $0x160] sm:$0xff]  ;;  %v517_v33 = vld [vmem:[%s3882_s15 + $0x170] sm:$0xff]  ;;  %v520_v34 = vld [vmem:[%s3882_s15 + $0x188] sm:$0xff] }
  0x9b   : > { %825 = vmatprep.mubr.f32.mxu1 %v482_v41  ;;  %v522_v35 = vld [vmem:[%s3882_s15 + $0x198] sm:$0xff]  ;;  %v519_v36 = vld [vmem:[%s3882_s15 + $0x180] sm:$0xff]  ;;  %v521_v37 = vld [vmem:[%s3882_s15 + $0x190] sm:$0xff] }
  0x9c   : > { %681 = vmatmul.mubr.f32.gmra.mrb[4].mxu0 %v479_v42  ;;  %v524_v38 = vld [vmem:[%s3882_s15 + $0x1a8] sm:$0xff]  ;;  %v526_v39 = vld [vmem:[%s3882_s15 + $0x1b8] sm:$0xff]  ;;  %v523_v40 = vld [vmem:[%s3882_s15 + $0x1a0] sm:$0xff] }
  0x9d   : > { %685 = vmatprep.mubr.f32.mxu0 %v484_v44  ;;  %2994 = vmatpush3.bf16.msra.mxu0 %v2991_v62  ;;  %v525_v41 = vld [vmem:[%s3882_s15 + $0x1b0] sm:$0xff]  ;;  %v528_v42 = vld [vmem:[%s3882_s15 + $0x1c8] sm:$0xff]  ;;  %v527_v44 = vld [vmem:[%s3882_s15 + $0x1c0] sm:$0xff] }
  0x9e   : > { %826 = vmatmul.mubr.f32.gmra.mrb[4].mxu1 %v481_v43  ;;  %2996 = vmatprep.subr.bf16.mxu0 %v2995_v5  ;;  %v530_v43 = vld [vmem:[%s3882_s15 + $0x1d8] sm:$0xff]  ;;  %v532_v46 = vld [vmem:[%s3882_s15 + $0x1e8] sm:$0xff]  ;;  %v531_v48 = vld [vmem:[%s3882_s15 + $0x1e0] sm:$0xff] }
  0x9f   : > { %830 = vmatprep.mubr.f32.mxu1 %v486_v45  ;;  %v529_v45 = vld [vmem:[%s3882_s15 + $0x1d0] sm:$0xff]  ;;  %v534_v47 = vld [vmem:[%s3882_s15 + $0x1f8] sm:$0xff]  ;;  %v925_v51 = vld [vmem:[%s5019_s4 + $0x68] sm:$0xff] }
  0xa0   : > { %686 = vmatmul.mubr.f32.gmra.mrb[6].mxu0 %v483_v50  ;;  %v533_v49 = vld [vmem:[%s3882_s15 + $0x1f0] sm:$0xff]  ;;  %v924_v50 = vld [vmem:[%s5019_s4 + $0x60] sm:$0xff]  ;;  %s3630_s15 = smov 64  }
  0xa1   : > { %690 = vmatprep.mubr.f32.mxu0 %v488_v53  ;;  %2998 = vmatpush3.bf16.msra.mxu0 %v2995_v5  ;;  %v926_v53 = vld [vmem:[%s5019_s4 + $0x70] sm:$0xff]  ;;  %v4007_v57 = vld [vmem:[%s5018_s3] ss:$0 sm:$0xff] }
  0xa2   : > { %831 = vmatmul.mubr.f32.gmra.mrb[6].mxu1 %v485_v52  ;;  %3000 = vmatprep.subr.bf16.mxu0 %v2999_v12  ;;  %v3007_v52 = vpack.c.bf16 %v925_v51, %v924_v50 }
  0xa3   : > { %835 = vmatprep.mubr.f32.mxu1 %v490_v54  ;;  %v927_v54 = vld [vmem:[%s5019_s4 + $0x78] sm:$0xff] }
  0xa4   : > { %691 = vmatmul.mubr.f32.gmra.mrb[8].mxu0 %v487_v58  ;;  %v3011_v55 = vpack.c.bf16 %v927_v54, %v926_v53 }
  0xa5   : > { %695 = vmatprep.mubr.f32.mxu0 %v492_v60  ;;  %3002 = vmatpush3.bf16.msra.mxu0 %v2999_v12 }
  0xa6   : > { %836 = vmatmul.mubr.f32.gmra.mrb[8].mxu1 %v489_v59  ;;  %3004 = vmatprep.subr.bf16.mxu0 %v3003_v19 }
  0xa7   : > { %840 = vmatprep.mubr.f32.mxu1 %v494_v61 }
  0xa8   : > { %696 = vmatmul.mubr.f32.gmra.mrb[10].mxu0 %v491_v1 }
  0xa9   : > { %700 = vmatprep.mubr.f32.mxu0 %v496_v3  ;;  %3006 = vmatpush3.bf16.msra.mxu0 %v3003_v19 }
  0xaa   : > { %841 = vmatmul.mubr.f32.gmra.mrb[10].mxu1 %v493_v2  ;;  %3008 = vmatprep.subr.bf16.mxu0 %v3007_v52 }
  0xab   : > { %845 = vmatprep.mubr.f32.mxu1 %v498_v4 }
  0xac   : > { %701 = vmatmul.mubr.f32.gmra.mrb[12].mxu0 %v495_v8 }
  0xad   : > { %705 = vmatprep.mubr.f32.mxu0 %v500_v10  ;;  %3010 = vmatpush3.bf16.msra.mxu0 %v3007_v52 }
  0xae   : > { %846 = vmatmul.mubr.f32.gmra.mrb[12].mxu1 %v497_v9  ;;  %3012 = vmatprep.subr.bf16.mxu0 %v3011_v55 }
  0xaf   : > { %850 = vmatprep.mubr.f32.mxu1 %v502_v11 }
  0xb0   : > { %706 = vmatmul.mubr.f32.gmra.mrb[14].mxu0 %v499_v15 }
  0xb1   : > { %710 = vmatprep.mubr.f32.mxu0 %v504_v17  ;;  %3014 = vmatpush3.bf16.msra.mxu0 %v3011_v55 }
  0xb2   : > { %851 = vmatmul.mubr.f32.gmra.mrb[14].mxu1 %v501_v16 }
  0xb3   : > { %855 = vmatprep.mubr.f32.mxu1 %v506_v18 }
  0xb4   : > { %711 = vmatmul.mubr.f32.gmra.mrb[16].mxu0 %v503_v20 }
  0xb5   : > { %715 = vmatprep.mubr.f32.mxu0 %v508_v22 }
  0xb6   : > { %856 = vmatmul.mubr.f32.gmra.mrb[16].mxu1 %v505_v21 }
  0xb7   : > { %860 = vmatprep.mubr.f32.mxu1 %v510_v23 }
  0xb8   : > { %716 = vmatmul.mubr.f32.gmra.mrb[18].mxu0 %v507_v24 }
  0xb9   : > { %720 = vmatprep.mubr.f32.mxu0 %v512_v26 }
  0xba   : > { %861 = vmatmul.mubr.f32.gmra.mrb[18].mxu1 %v509_v25 }
  0xbb   : > { %865 = vmatprep.mubr.f32.mxu1 %v514_v27 }
  0xbc   : > { %721 = vmatmul.mubr.f32.gmra.mrb[20].mxu0 %v511_v28 }
  0xbd   : > { %725 = vmatprep.mubr.f32.mxu0 %v516_v30 }
  0xbe   : > { %866 = vmatmul.mubr.f32.gmra.mrb[20].mxu1 %v513_v29 }
  0xbf   : > { %870 = vmatprep.mubr.f32.mxu1 %v518_v31 }
  0xc0   : > { %726 = vmatmul.mubr.f32.gmra.mrb[22].mxu0 %v515_v32 }
  0xc1   : > { %730 = vmatprep.mubr.f32.mxu0 %v520_v34 }
  0xc2   : > { %871 = vmatmul.mubr.f32.gmra.mrb[22].mxu1 %v517_v33 }
  0xc3   : > { %875 = vmatprep.mubr.f32.mxu1 %v522_v35 }
  0xc4   : > { %731 = vmatmul.mubr.f32.gmra.mrb[24].mxu0 %v519_v36 }
  0xc5   : > { %735 = vmatprep.mubr.f32.mxu0 %v524_v38 }
  0xc6   : > { %876 = vmatmul.mubr.f32.gmra.mrb[24].mxu1 %v521_v37 }
  0xc7   : > { %880 = vmatprep.mubr.f32.mxu1 %v526_v39 }
  0xc8   : > { %736 = vmatmul.mubr.f32.gmra.mrb[26].mxu0 %v523_v40 }
  0xc9   : > { %740 = vmatprep.mubr.f32.mxu0 %v528_v42 }
  0xca   : > { %881 = vmatmul.mubr.f32.gmra.mrb[26].mxu1 %v525_v41 }
  0xcb   : > { %885 = vmatprep.mubr.f32.mxu1 %v530_v43 }
  0xcc   : > { %741 = vmatmul.mubr.f32.gmra.mrb[28].mxu0 %v527_v44 }
  0xcd   : > { %745 = vmatprep.mubr.f32.mxu0 %v532_v46 }
  0xce   : > { %886 = vmatmul.mubr.f32.gmra.mrb[28].mxu1 %v529_v45 }
  0xcf   : > { %890 = vmatprep.mubr.f32.mxu1 %v534_v47 }
  0xd0   : > { %746 = vmatmul.mubr.f32.gmra.mrb[30].mxu0 %v531_v48 }
  0xd2   : > { %891 = vmatmul.mubr.f32.gmra.mrb[30].mxu1 %v533_v49 }
 0x167   : > { %v2639_v56 = vpop.f32.mrb[0].mxu0 }
 0x168   : > { %v2640_v58 = vpop.f32.mrb[1].mxu0 }
 0x169   : > { %v2719_v59 = vpop.f32.mrb[0].mxu1  ;;  %v2641_v60 = vadd.f32 %v2640_v58, %v2639_v56 }
 0x16a   : > { %v2720_v61 = vpop.f32.mrb[1].mxu1 }
 0x16b   : > { %v2721_v62 = vadd.f32 %v2720_v61, %v2719_v59  ;;  %v673_v63 = vadd.f32 %v2641_v60, %v4007_v57  ;;  %v2642_v0 = vpop.f32.mrb[2].mxu0 }
 0x16c   : > { %v2643_v1 = vpop.f32.mrb[3].mxu0 }
 0x16d   : > { %v2722_v2 = vpop.f32.mrb[2].mxu1  ;;  %v818_v3 = vadd.f32 %v2721_v62, %v673_v63  ;;  %v2644_v4 = vadd.f32 %v2643_v1, %v2642_v0 }
 0x16e   : > { %v2723_v5 = vpop.f32.mrb[3].mxu1 }
 0x16f   : > { %v2724_v6 = vadd.f32 %v2723_v5, %v2722_v2  ;;  %3177 = vtanh.f32 %v818_v3  ;;  %v678_v7 = vadd.f32 %v2644_v4, %v4007_v57  ;;  %v2645_v8 = vpop.f32.mrb[4].mxu0 }
 0x170   : > { %v2646_v9 = vpop.f32.mrb[5].mxu0 }
 0x171   : > { %v2725_v10 = vpop.f32.mrb[4].mxu1  ;;  %v823_v11 = vadd.f32 %v2724_v6, %v678_v7  ;;  %v2647_v12 = vadd.f32 %v2646_v9, %v2645_v8 }
 0x172   : > { %v2726_v13 = vpop.f32.mrb[5].mxu1 }
 0x173   : > { %v2727_v14 = vadd.f32 %v2726_v13, %v2725_v10  ;;  %3179 = vtanh.f32 %v823_v11  ;;  %v683_v15 = vadd.f32 %v2647_v12, %v4007_v57  ;;  %v2648_v16 = vpop.f32.mrb[6].mxu0 }
 0x174   : > { %v2649_v17 = vpop.f32.mrb[7].mxu0 }
 0x175   : > { %v2728_v18 = vpop.f32.mrb[6].mxu1  ;;  %v828_v19 = vadd.f32 %v2727_v14, %v683_v15  ;;  %v2650_v20 = vadd.f32 %v2649_v17, %v2648_v16 }
 0x176   : > { %v2729_v21 = vpop.f32.mrb[7].mxu1 }
 0x177   : > { %v2730_v22 = vadd.f32 %v2729_v21, %v2728_v18  ;;  %3181 = vtanh.f32 %v828_v19  ;;  %v688_v23 = vadd.f32 %v2650_v20, %v4007_v57  ;;  %v2651_v24 = vpop.f32.mrb[8].mxu0 }
 0x178   : > { %v2652_v25 = vpop.f32.mrb[9].mxu0 }
 0x179   : > { %v2731_v26 = vpop.f32.mrb[8].mxu1  ;;  %v3178_v27 = vpop.eup %3177  ;;  %v833_v28 = vadd.f32 %v2730_v22, %v688_v23  ;;  %v2653_v29 = vadd.f32 %v2652_v25, %v2651_v24 }
 0x17a   : > { %v2732_v30 = vpop.f32.mrb[9].mxu1  ;;  %2855 = vmatprep.mubr.f32.mxu0 %v3178_v27 }
 0x17b   : > { %v2733_v31 = vadd.f32 %v2732_v30, %v2731_v26  ;;  %3183 = vtanh.f32 %v833_v28  ;;  %v693_v32 = vadd.f32 %v2653_v29, %v4007_v57  ;;  %v2654_v33 = vpop.f32.mrb[10].mxu0 }
 0x17c   : > { %v2655_v34 = vpop.f32.mrb[11].mxu0 }
 0x17d   : > { %v2734_v35 = vpop.f32.mrb[10].mxu1  ;;  %v3180_v36 = vpop.eup %3179  ;;  %v2656_v37 = vadd.f32 %v2655_v34, %v2654_v33  ;;  %v838_v38 = vadd.f32 %v2733_v31, %v693_v32 }
 0x17e   : > { %v2735_v39 = vpop.f32.mrb[11].mxu1  ;;  %2856 = vmatmul.mubr.f32.vlgmr.msra.gmra.mrb[32].mxu0 %v3180_v36 }
 0x17f   : > { %v2736_v40 = vadd.f32 %v2735_v39, %v2734_v35  ;;  %v698_v41 = vadd.f32 %v2656_v37, %v4007_v57  ;;  %3185 = vtanh.f32 %v838_v38  ;;  %v2657_v42 = vpop.f32.mrb[12].mxu0 }
 0x180   : > { %v2658_v43 = vpop.f32.mrb[13].mxu0 }
 0x181   : > { %v2737_v44 = vpop.f32.mrb[12].mxu1  ;;  %v3182_v45 = vpop.eup %3181  ;;  %v843_v46 = vadd.f32 %v2736_v40, %v698_v41  ;;  %v2659_v47 = vadd.f32 %v2658_v43, %v2657_v42 }
 0x182   : > { %v2738_v48 = vpop.f32.mrb[13].mxu1  ;;  %2858 = vmatprep.mubr.f32.mxu0 %v3182_v45 }
 0x183   : > { %v2739_v49 = vadd.f32 %v2738_v48, %v2737_v44  ;;  %3187 = vtanh.f32 %v843_v46  ;;  %v703_v50 = vadd.f32 %v2659_v47, %v4007_v57  ;;  %v2660_v51 = vpop.f32.mrb[14].mxu0 }
 0x184   : > { %v2661_v52 = vpop.f32.mrb[15].mxu0 }
 0x185   : > { %v2740_v53 = vpop.f32.mrb[14].mxu1  ;;  %v3184_v54 = vpop.eup %3183  ;;  %v2662_v55 = vadd.f32 %v2661_v52, %v2660_v51  ;;  %v848_v56 = vadd.f32 %v2739_v49, %v703_v50 }
 0x186   : > { %v2741_v58 = vpop.f32.mrb[15].mxu1  ;;  %2859 = vmatmul.mubr.f32.gmra.mrb[34].mxu0 %v3184_v54 }
 0x187   : > { %v2742_v59 = vadd.f32 %v2741_v58, %v2740_v53  ;;  %v708_v60 = vadd.f32 %v2662_v55, %v4007_v57  ;;  %3189 = vtanh.f32 %v848_v56  ;;  %v2663_v61 = vpop.f32.mrb[16].mxu0 }
 0x188   : > { %v2664_v62 = vpop.f32.mrb[17].mxu0 }
 0x189   : > { %v2743_v63 = vpop.f32.mrb[16].mxu1  ;;  %v3186_v0 = vpop.eup %3185  ;;  %v853_v1 = vadd.f32 %v2742_v59, %v708_v60  ;;  %v2665_v2 = vadd.f32 %v2664_v62, %v2663_v61 }
 0x18a   : > { %v2744_v3 = vpop.f32.mrb[17].mxu1  ;;  %2861 = vmatprep.mubr.f32.mxu0 %v3186_v0 }
 0x18b   : > { %v2745_v4 = vadd.f32 %v2744_v3, %v2743_v63  ;;  %3191 = vtanh.f32 %v853_v1  ;;  %v713_v5 = vadd.f32 %v2665_v2, %v4007_v57  ;;  %v2666_v6 = vpop.f32.mrb[18].mxu0 }
 0x18c   : > { %v2667_v7 = vpop.f32.mrb[19].mxu0 }
 0x18d   : > { %v2746_v8 = vpop.f32.mrb[18].mxu1  ;;  %v3188_v9 = vpop.eup %3187  ;;  %v2668_v10 = vadd.f32 %v2667_v7, %v2666_v6  ;;  %v858_v11 = vadd.f32 %v2745_v4, %v713_v5 }
 0x18e   : > { %v2747_v12 = vpop.f32.mrb[19].mxu1  ;;  %2862 = vmatmul.mubr.f32.gmra.mrb[36].mxu0 %v3188_v9 }
 0x18f   : > { %v2748_v13 = vadd.f32 %v2747_v12, %v2746_v8  ;;  %v718_v14 = vadd.f32 %v2668_v10, %v4007_v57  ;;  %3193 = vtanh.f32 %v858_v11  ;;  %v2669_v15 = vpop.f32.mrb[20].mxu0  ;;  %v1240_v11 = vld [vmem:[%s5021_s6] sm:$0xff]  ;;  %v1241_v12 = vld [vmem:[%s5021_s6 + $0x8] sm:$0xff] }
 0x190   : > { %v2670_v16 = vpop.f32.mrb[21].mxu0 }
 0x191   : > { %v2749_v17 = vpop.f32.mrb[20].mxu1  ;;  %v3190_v18 = vpop.eup %3189  ;;  %v863_v19 = vadd.f32 %v2748_v13, %v718_v14  ;;  %v2671_v20 = vadd.f32 %v2670_v16, %v2669_v15  ;;  %v3015_v13 = vpack.c.bf16 %v1241_v12, %v1240_v11  ;;  %v1243_v14 = vld [vmem:[%s5021_s6 + $0x18] sm:$0xff]  ;;  %v1244_v16 = vld [vmem:[%s5021_s6 + $0x20] sm:$0xff] }
 0x192   : > { %v2750_v21 = vpop.f32.mrb[21].mxu1  ;;  %2864 = vmatprep.mubr.f32.mxu0 %v3190_v18 }
 0x193   : > { %v2751_v22 = vadd.f32 %v2750_v21, %v2749_v17  ;;  %3195 = vtanh.f32 %v863_v19  ;;  %v723_v23 = vadd.f32 %v2671_v20, %v4007_v57  ;;  %v2672_v24 = vpop.f32.mrb[22].mxu0  ;;  %v1245_v17 = vld [vmem:[%s5021_s6 + $0x28] sm:$0xff]  ;;  %3016 = vmatprep.subr.bf16.mxu1 %v3015_v13  ;;  %v1246_v19 = vld [vmem:[%s5021_s6 + $0x30] sm:$0xff]  ;;  %v1247_v20 = vld [vmem:[%s5021_s6 + $0x38] sm:$0xff] }
 0x194   : > { %v2673_v25 = vpop.f32.mrb[23].mxu0  ;;  %3018 = vmatpush3.bf16.msra.mxu1 %v3015_v13  ;;  %v3023_v18 = vpack.c.bf16 %v1245_v17, %v1244_v16  ;;  %v3027_v21 = vpack.c.bf16 %v1247_v20, %v1246_v19 }
 0x195   : > { %v2752_v26 = vpop.f32.mrb[22].mxu1  ;;  %v3192_v27 = vpop.eup %3191  ;;  %v2674_v28 = vadd.f32 %v2673_v25, %v2672_v24  ;;  %v868_v29 = vadd.f32 %v2751_v22, %v723_v23  ;;  %v4053_v22 = vld [vmem:[%s5020_s5] ss:$0 sm:$0xff] }
 0x196   : > { %v2753_v30 = vpop.f32.mrb[23].mxu1  ;;  %2865 = vmatmul.mubr.f32.gmra.mrb[38].mxu0 %v3192_v27 }
 0x197   : > { %v2754_v31 = vadd.f32 %v2753_v30, %v2752_v26  ;;  %v728_v32 = vadd.f32 %v2674_v28, %v4007_v57  ;;  %3197 = vtanh.f32 %v868_v29  ;;  %v2675_v33 = vpop.f32.mrb[24].mxu0 }
 0x198   : > { %v2676_v34 = vpop.f32.mrb[25].mxu0 }
 0x199   : > { %v2755_v35 = vpop.f32.mrb[24].mxu1  ;;  %v3194_v36 = vpop.eup %3193  ;;  %v873_v37 = vadd.f32 %v2754_v31, %v728_v32  ;;  %v2677_v38 = vadd.f32 %v2676_v34, %v2675_v33 }
 0x19a   : > { %v2756_v39 = vpop.f32.mrb[25].mxu1  ;;  %2867 = vmatprep.mubr.f32.mxu0 %v3194_v36 }
 0x19b   : > { %v2757_v40 = vadd.f32 %v2756_v39, %v2755_v35  ;;  %3199 = vtanh.f32 %v873_v37  ;;  %v733_v41 = vadd.f32 %v2677_v38, %v4007_v57  ;;  %v2678_v42 = vpop.f32.mrb[26].mxu0 }
 0x19c   : > { %v2679_v43 = vpop.f32.mrb[27].mxu0 }
 0x19d   : > { %v2758_v44 = vpop.f32.mrb[26].mxu1  ;;  %v3196_v45 = vpop.eup %3195  ;;  %v2680_v46 = vadd.f32 %v2679_v43, %v2678_v42  ;;  %v878_v47 = vadd.f32 %v2757_v40, %v733_v41 }
 0x19e   : > { %v2759_v48 = vpop.f32.mrb[27].mxu1  ;;  %2868 = vmatmul.mubr.f32.gmra.mrb[40].mxu0 %v3196_v45 }
 0x19f   : > { %v2760_v49 = vadd.f32 %v2759_v48, %v2758_v44  ;;  %v738_v50 = vadd.f32 %v2680_v46, %v4007_v57  ;;  %3201 = vtanh.f32 %v878_v47  ;;  %v2681_v51 = vpop.f32.mrb[28].mxu0 }
 0x1a0   : > { %v2682_v52 = vpop.f32.mrb[29].mxu0 }
 0x1a1   : > { %v2761_v53 = vpop.f32.mrb[28].mxu1  ;;  %v3198_v54 = vpop.eup %3197  ;;  %v883_v55 = vadd.f32 %v2760_v49, %v738_v50  ;;  %v2683_v56 = vadd.f32 %v2682_v52, %v2681_v51 }
 0x1a2   : > { %v2762_v58 = vpop.f32.mrb[29].mxu1  ;;  %2870 = vmatprep.mubr.f32.mxu0 %v3198_v54 }
 0x1a3   : > { %v2763_v59 = vadd.f32 %v2762_v58, %v2761_v53  ;;  %3203 = vtanh.f32 %v883_v55  ;;  %v743_v60 = vadd.f32 %v2683_v56, %v4007_v57  ;;  %v2684_v61 = vpop.f32.mrb[30].mxu0 }
 0x1a4   : > { %v2685_v62 = vpop.f32.mrb[31].mxu0 }
 0x1a5   : > { %v2764_v63 = vpop.f32.mrb[30].mxu1  ;;  %v3200_v0 = vpop.eup %3199  ;;  %v2686_v1 = vadd.f32 %v2685_v62, %v2684_v61  ;;  %v888_v2 = vadd.f32 %v2763_v59, %v743_v60 }
 0x1a6   : > { %v2765_v3 = vpop.f32.mrb[31].mxu1  ;;  %2871 = vmatmul.mubr.f32.gmra.mrb[42].mxu0 %v3200_v0 }
 0x1a7   : > { %v2766_v4 = vadd.f32 %v2765_v3, %v2764_v63  ;;  %v748_v5 = vadd.f32 %v2686_v1, %v4007_v57  ;;  %3205 = vtanh.f32 %v888_v2  ;;  %v1242_v57 = vld [vmem:[%s5021_s6 + $0x10] sm:$0xff] }
 0x1a8   : > { %v3019_v15 = vpack.c.bf16 %v1243_v14, %v1242_v57 }
 0x1a9   : > { %v3202_v6 = vpop.eup %3201  ;;  %v893_v7 = vadd.f32 %v2766_v4, %v748_v5 }
 0x1aa   : > { %2873 = vmatprep.mubr.f32.mxu0 %v3202_v6  ;;  %3020 = vmatprep.subr.bf16.mxu1 %v3019_v15 }
 0x1ab   : > { %3207 = vtanh.f32 %v893_v7  ;;  %3022 = vmatpush3.bf16.msra.mxu1 %v3019_v15 }
 0x1ac   : > { %3024 = vmatprep.subr.bf16.mxu1 %v3023_v18 }
 0x1ad   : > { %v3204_v8 = vpop.eup %3203 }
 0x1ae   : > { %2874 = vmatmul.mubr.f32.gmra.mrb[44].mxu0 %v3204_v8 }
 0x1af   : > { %3026 = vmatpush3.bf16.msra.mxu1 %v3023_v18 }
 0x1b0   : > { %3028 = vmatprep.subr.bf16.mxu1 %v3027_v21 }
 0x1b1   : > { %v3206_v9 = vpop.eup %3205 }
 0x1b2   : > { %2876 = vmatprep.mubr.f32.mxu0 %v3206_v9 }
 0x1b3   : > { %3030 = vmatpush3.bf16.msra.mxu1 %v3027_v21 }
 0x1b5   : > { %v3208_v10 = vpop.eup %3207 }
 0x1b6   : > { %2877 = vmatmul.mubr.f32.gmra.mrb[46].mxu0 %v3208_v10 }
 0x251   : > { %v2857_v23 = vpop.f32.mrb[32].mxu0 }
 0x252   : > { %v4056_v24 = vadd.f32 %v2857_v23, %v4053_v22  ;;  %v1001_v25 = vpop.f32.mrb[33].mxu0 }
 0x253   : > { %v4059_v26 = vadd.f32 %v4053_v22, %v1001_v25 }
 0x254   : > { %2370 = vst [vmem:[%s4061_s25 + $0x8] sm:$0xff] %v4056_v24  ;;  %v1081_v27 = vmul.f32 0.5, %v4056_v24 }
 0x255   : > { %v1080_v28 = vmul.f32 0.5, %v4059_v26  ;;  %2369 = vst [vmem:[%s4061_s25] sm:$0xff] %v4059_v26 }
 0x256   : > { %v1098_v30 = vmul.f32 1.442695, %v1081_v27 }
 0x257   : > { %v1096_v29 = vmul.f32 1.442695, %v1080_v28 }
 0x259   : > { %3209 = vpow2.f32 %v1096_v29  ;;  %v2860_v31 = vpop.f32.mrb[34].mxu0 }
 0x25a   : > { %v4070_v32 = vadd.f32 %v2860_v31, %v4053_v22  ;;  %v1011_v33 = vpop.f32.mrb[35].mxu0  ;;  %3211 = vpow2.f32 %v1098_v30 }
 0x25b   : > { %v4073_v34 = vadd.f32 %v4053_v22, %v1011_v33 }
 0x25c   : > { %2372 = vst [vmem:[%s4061_s25 + $0x18] sm:$0xff] %v4070_v32  ;;  %v1083_v35 = vmul.f32 0.5, %v4070_v32 }
 0x25d   : > { %v1082_v36 = vmul.f32 0.5, %v4073_v34  ;;  %2371 = vst [vmem:[%s4061_s25 + $0x10] sm:$0xff] %v4073_v34 }
 0x25e   : > { %v1102_v38 = vmul.f32 1.442695, %v1083_v35 }
 0x25f   : > { %v1100_v37 = vmul.f32 1.442695, %v1082_v36 }
 0x261   : > { %3213 = vpow2.f32 %v1100_v37  ;;  %v2863_v39 = vpop.f32.mrb[36].mxu0 }
 0x262   : > { %v4082_v40 = vadd.f32 %v2863_v39, %v4053_v22  ;;  %v1021_v41 = vpop.f32.mrb[37].mxu0  ;;  %3215 = vpow2.f32 %v1102_v38 }
 0x263   : > { %v3210_v42 = vpop.eup %3209  ;;  %v4085_v43 = vadd.f32 %v4053_v22, %v1021_v41 }
 0x264   : > { %v1085_v44 = vmul.f32 0.5, %v4082_v40  ;;  %2374 = vst [vmem:[%s4061_s25 + $0x28] sm:$0xff] %v4082_v40  ;;  %1160 = vrot.lane.b32.xlu0 %v3210_v42, %s3630_s15  ;;  %v3212_v47 = vpop.eup %3211 }
 0x265   : > { %v1084_v45 = vmul.f32 0.5, %v4085_v43  ;;  %2373 = vst [vmem:[%s4061_s25 + $0x20] sm:$0xff] %v4085_v43 }
 0x266   : > { %v1106_v46 = vmul.f32 1.442695, %v1085_v44  ;;  %v1470_v44 = vld [vmem:[#allocation7 + $0x28] sm:$0xff] }
 0x267   : > { %v1104_v48 = vmul.f32 1.442695, %v1084_v45  ;;  %v1465_v45 = vld [vmem:[#allocation7] sm:$0xff] }
 0x268   : > { %3217 = vpow2.f32 %v1106_v46  ;;  %1162 = vrot.lane.b32.xlu0 %v3212_v47, %s3630_s15  ;;  %v1469_v47 = vld [vmem:[#allocation7 + $0x20] sm:$0xff] }
 0x269   : > { %3219 = vpow2.f32 %v1104_v48  ;;  %v2866_v49 = vpop.f32.mrb[38].mxu0  ;;  %v1468_v48 = vld [vmem:[#allocation7 + $0x18] sm:$0xff] }
 0x26a   : > { %v4096_v50 = vadd.f32 %v2866_v49, %v4053_v22  ;;  %v1031_v51 = vpop.f32.mrb[39].mxu0  ;;  %v1472_v49 = vld [vmem:[#allocation7 + $0x38] sm:$0xff] }
 0x26b   : > { %v3214_v52 = vpop.eup %3213  ;;  %v4099_v53 = vadd.f32 %v4053_v22, %v1031_v51  ;;  %v3033_v51 = vpack.c.bf16 %v1469_v47, %v1465_v45  ;;  %v1475_v45 = vld [vmem:[#allocation7 + $0x50] sm:$0xff] }
 0x26c   : > { %v1087_v54 = vmul.f32 0.5, %v4096_v50  ;;  %2376 = vst [vmem:[%s4061_s25 + $0x38] sm:$0xff] %v4096_v50  ;;  %1164 = vrot.lane.b32.xlu1 %v3214_v52, %s3630_s15  ;;  %v3216_v58 = vpop.eup %3215  ;;  %v3063_v52 = vpack.c.bf16 %v1472_v49, %v1468_v48  ;;  %v1484_v48 = vld [vmem:[#allocation7 + $0x98] sm:$0xff] }
 0x26d   : > { %v1086_v55 = vmul.f32 0.5, %v4099_v53  ;;  %2375 = vst [vmem:[%s4061_s25 + $0x30] sm:$0xff] %v4099_v53  ;;  %v1488_v49 = vld [vmem:[#allocation7 + $0xb8] sm:$0xff] }
 0x26e   : > { %v1110_v56 = vmul.f32 1.442695, %v1087_v54  ;;  %v1474_v54 = vld [vmem:[#allocation7 + $0x48] sm:$0xff]  ;;  %3064 = vmatprep.subr.bf16.mxu1 %v3063_v52 }
 0x26f   : > { %v1108_v59 = vmul.f32 1.442695, %v1086_v55  ;;  %v1478_v55 = vld [vmem:[#allocation7 + $0x68] sm:$0xff] }
 0x270   : > { %3221 = vpow2.f32 %v1110_v56  ;;  %1166 = vrot.lane.b32.xlu1 %v3216_v58, %s3630_s15  ;;  %v1473_v56 = vld [vmem:[#allocation7 + $0x40] sm:$0xff] }
 0x271   : > { %3223 = vpow2.f32 %v1108_v59  ;;  %v2869_v60 = vpop.f32.mrb[40].mxu0  ;;  %v1477_v58 = vld [vmem:[#allocation7 + $0x60] sm:$0xff]  ;;  %v3035_v59 = vpack.c.bf16 %v1478_v55, %v1474_v54  ;;  %v3071_v55 = vpack.c.bf16 %v1488_v49, %v1484_v48 }
 0x272   : > { %v3218_v61 = vpop.eup %3217  ;;  %v4110_v62 = vadd.f32 %v2869_v60, %v4053_v22  ;;  %v1041_v63 = vpop.f32.mrb[41].mxu0  ;;  %v3037_v60 = vpack.c.bf16 %v1477_v58, %v1473_v56  ;;  %v1483_v56 = vld [vmem:[#allocation7 + $0x90] sm:$0xff] }
 0x273   : > { %v3220_v0 = vpop.eup %3219  ;;  %v4113_v1 = vadd.f32 %v4053_v22, %v1041_v63  ;;  %v1486_v63 = vld [vmem:[#allocation7 + $0xa8] sm:$0xff] }
 0x274   : > { %v1089_v2 = vmul.f32 0.5, %v4110_v62  ;;  %2378 = vst [vmem:[%s4061_s25 + $0x48] sm:$0xff] %v4110_v62  ;;  %1170 = vrot.lane.b32.xlu1 %v3218_v61, %s3630_s15  ;;  %1168 = vrot.lane.b32.xlu0 %v3220_v0, %s3630_s15  ;;  %v1482_v61 = vld [vmem:[#allocation7 + $0x88] sm:$0xff] }
 0x275   : > { %v1088_v3 = vmul.f32 0.5, %v4113_v1  ;;  %2377 = vst [vmem:[%s4061_s25 + $0x40] sm:$0xff] %v4113_v1 }
 0x276   : > { %v1114_v4 = vmul.f32 1.442695, %v1089_v2  ;;  %v3039_v2 = vpack.c.bf16 %v1486_v63, %v1482_v61  ;;  %v1133_v63 = vld [vmem:[%s4173_s27 + $0x28] sm:$0xff] }
 0x277   : > { %v1112_v5 = vmul.f32 1.442695, %v1088_v3  ;;  %v1481_v3 = vld [vmem:[#allocation7 + $0x80] sm:$0xff] }
 0x278   : > { %3225 = vpow2.f32 %v1114_v4  ;;  %v1485_v4 = vld [vmem:[#allocation7 + $0xa0] sm:$0xff] }
 0x279   : > { %3227 = vpow2.f32 %v1112_v5  ;;  %v2872_v6 = vpop.f32.mrb[42].mxu0 }
 0x27a   : > { %v3222_v7 = vpop.eup %3221  ;;  %v4124_v8 = vadd.f32 %v2872_v6, %v4053_v22  ;;  %v1051_v9 = vpop.f32.mrb[43].mxu0  ;;  %v3041_v6 = vpack.c.bf16 %v1485_v4, %v1481_v3 }
 0x27b   : > { %v3224_v10 = vpop.eup %3223  ;;  %v4127_v11 = vadd.f32 %v4053_v22, %v1051_v9  ;;  %1174 = vrot.lane.b32.xlu1 %v3222_v7, %s3630_s15  ;;  %v1490_v7 = vld [vmem:[#allocation7 + $0xc8] sm:$0xff] }
 0x27c   : > { %v1091_v12 = vmul.f32 0.5, %v4124_v8  ;;  %2380 = vst [vmem:[%s4061_s25 + $0x58] sm:$0xff] %v4124_v8  ;;  %1172 = vrot.lane.b32.xlu0 %v3224_v10, %s3630_s15  ;;  %v1494_v9 = vld [vmem:[#allocation7 + $0xe8] sm:$0xff] }
 0x27d   : > { %v1090_v57 = vmul.f32 0.5, %v4127_v11  ;;  %2379 = vst [vmem:[%s4061_s25 + $0x50] sm:$0xff] %v4127_v11  ;;  %v3043_v10 = vpack.c.bf16 %v1494_v9, %v1490_v7  ;;  %v1495_v7 = vld [vmem:[#allocation7 + $0xf0] sm:$0xff] }
 0x27e   : > { %v1118_v13 = vmul.f32 1.442695, %v1091_v12  ;;  %v1489_v12 = vld [vmem:[#allocation7 + $0xc0] sm:$0xff] }
 0x27f   : > { %v1116_v14 = vmul.f32 1.442695, %v1090_v57  ;;  %v1493_v57 = vld [vmem:[#allocation7 + $0xe0] sm:$0xff] }
 0x280   : > { %3229 = vpow2.f32 %v1118_v13  ;;  %v1498_v13 = vld [vmem:[#allocation7 + $0x108] sm:$0xff] }
 0x281   : > { %3231 = vpow2.f32 %v1116_v14  ;;  %v2875_v15 = vpop.f32.mrb[44].mxu0  ;;  %v1502_v14 = vld [vmem:[#allocation7 + $0x128] sm:$0xff] }
 0x282   : > { %v3226_v16 = vpop.eup %3225  ;;  %v4138_v17 = vadd.f32 %v2875_v15, %v4053_v22  ;;  %v1061_v18 = vpop.f32.mrb[45].mxu0  ;;  %v3045_v15 = vpack.c.bf16 %v1493_v57, %v1489_v12  ;;  %v1500_v12 = vld [vmem:[#allocation7 + $0x118] sm:$0xff] }
 0x283   : > { %v3228_v19 = vpop.eup %3227  ;;  %v4141_v20 = vadd.f32 %v4053_v22, %v1061_v18  ;;  %1178 = vrot.lane.b32.xlu1 %v3226_v16, %s3630_s15  ;;  %v3047_v16 = vpack.c.bf16 %v1502_v14, %v1498_v13  ;;  %v1497_v18 = vld [vmem:[#allocation7 + $0x100] sm:$0xff]  ;;  %v1504_v57 = vld [vmem:[#allocation7 + $0x138] sm:$0xff] }
 0x284   : > { %v1093_v21 = vmul.f32 0.5, %v4138_v17  ;;  %2382 = vst [vmem:[%s4061_s25 + $0x68] sm:$0xff] %v4138_v17  ;;  %1176 = vrot.lane.b32.xlu0 %v3228_v19, %s3630_s15  ;;  %v1501_v19 = vld [vmem:[#allocation7 + $0x120] sm:$0xff] }
 0x285   : > { %v1092_v23 = vmul.f32 0.5, %v4141_v20  ;;  %2381 = vst [vmem:[%s4061_s25 + $0x60] sm:$0xff] %v4141_v20 }
 0x286   : > { %v1122_v25 = vmul.f32 1.442695, %v1093_v21  ;;  %v3049_v21 = vpack.c.bf16 %v1501_v19, %v1497_v18  ;;  %v1134_v18 = vld [vmem:[%s4173_s27 + $0x30] sm:$0xff] }
 0x287   : > { %v1120_v27 = vmul.f32 1.442695, %v1092_v23  ;;  %v1128_v23 = vld [vmem:[%s4173_s27] sm:$0xff] }
 0x288   : > { %3233 = vpow2.f32 %v1122_v25 }
 0x289   : > { %3235 = vpow2.f32 %v1120_v27  ;;  %v2878_v28 = vpop.f32.mrb[46].mxu0 }
 0x28a   : > { %v3230_v29 = vpop.eup %3229  ;;  %v4152_v30 = vadd.f32 %v2878_v28, %v4053_v22  ;;  %v1071_v31 = vpop.f32.mrb[47].mxu0  ;;  %v1129_v28 = vld [vmem:[%s4173_s27 + $0x8] sm:$0xff] }
 0x28b   : > { %v3232_v33 = vpop.eup %3231  ;;  %v4155_v35 = vadd.f32 %v4053_v22, %v1071_v31  ;;  %1182 = vrot.lane.b32.xlu1 %v3230_v29, %s3630_s15  ;;  %v1466_v22 = vld [vmem:[#allocation7 + $0x8] sm:$0xff]  ;;  %v1467_v31 = vld [vmem:[#allocation7 + $0x10] sm:$0xff] }
 0x28c   : > { %v1095_v36 = vmul.f32 0.5, %v4152_v30  ;;  %2384 = vst [vmem:[%s4061_s25 + $0x78] sm:$0xff] %v4152_v30  ;;  %1180 = vrot.lane.b32.xlu0 %v3232_v33, %s3630_s15  ;;  %v3031_v46 = vpack.c.bf16 %v1470_v44, %v1466_v22  ;;  %v1471_v33 = vld [vmem:[#allocation7 + $0x30] sm:$0xff] }
 0x28d   : > { %v1094_v37 = vmul.f32 0.5, %v4155_v35  ;;  %2383 = vst [vmem:[%s4061_s25 + $0x70] sm:$0xff] %v4155_v35  ;;  %s3525_s25 = scalar_lea.vmem %s3524_s26, 4096 }
 0x28e   : > { %v1126_v38 = vmul.f32 1.442695, %v1095_v36  ;;  %3032 = vmatprep.subr.bf16.mxu0 %v3031_v46  ;;  %v1479_v46 = vld [vmem:[#allocation7 + $0x70] sm:$0xff]  ;;  %p3527_p12 = scmp.lt.s32.totalorder %s3525_s25, %s3519_s17 }
 0x28f   : > { %v1124_v39 = vmul.f32 1.442695, %v1094_v37  ;;  %3034 = vmatpush1.bf16.msra.mxu0 %v3033_v51  ;;  %v1476_v37 = vld [vmem:[#allocation7 + $0x58] sm:$0xff]  ;;  %v3069_v52 = vpack.c.bf16 %v1479_v46, %v1475_v45 }
 0x290   : > { %3237 = vpow2.f32 %v1126_v38  ;;  %3036 = vmatprep.subr.bf16.mxu0 %v3035_v59  ;;  %v1480_v38 = vld [vmem:[#allocation7 + $0x78] sm:$0xff]  ;;  %p3528_p2 = por %p3527_p12, %p3526_p9 }
 0x291   : > { %3239 = vpow2.f32 %v1124_v39  ;;  %v3067_v44 = vpack.c.bf16 %v1480_v38, %v1476_v37  ;;  %v1131_v51 = vld [vmem:[%s4173_s27 + $0x18] sm:$0xff] }
 0x292   : > { %v3234_v41 = vpop.eup %3233  ;;  %v1492_v59 = vld [vmem:[#allocation7 + $0xd8] sm:$0xff]  ;;  %p3529_p13 = pnand %p3528_p2, %p3522_p5 }
 0x293   : > { %v3236_v42 = vpop.eup %3235  ;;  %1186 = vrot.lane.b32.xlu1 %v3234_v41, %s3630_s15  ;;  %3038 = vmatpush1.bf16.msra.mxu0 %v3037_v60  ;;  %v1130_v41 = vld [vmem:[%s4173_s27 + $0x10] sm:$0xff]  ;;  %v1496_v60 = vld [vmem:[#allocation7 + $0xf8] sm:$0xff] }
 0x294   : > { %1184 = vrot.lane.b32.xlu0 %v3236_v42, %s3630_s15  ;;  %3040 = vmatprep.subr.bf16.mxu0 %v3039_v2  ;;  %v3065_v42 = vpack.c.bf16 %v1471_v33, %v1467_v31  ;;  %v3075_v4 = vpack.c.bf16 %v1496_v60, %v1492_v59  ;;  %v1506_v60 = vld [vmem:[#allocation7 + $0x148] sm:$0xff] }
 0x297   : > { %3042 = vmatpush1.bf16.msra.mxu0 %v3041_v6  ;;  %v1491_v6 = vld [vmem:[#allocation7 + $0xd0] sm:$0xff] }
 0x298   : > { %3044 = vmatprep.subr.bf16.mxu0 %v3043_v10 }
 0x29a   : > { %v3238_v0 = vpop.eup %3237 }
 0x29b   : > { %v3240_v5 = vpop.eup %3239  ;;  %1190 = vrot.lane.b32.xlu1 %v3238_v0, %s3630_s15  ;;  %3046 = vmatpush1.bf16.msra.mxu0 %v3045_v15  ;;  %v1132_v0 = vld [vmem:[%s4173_s27 + $0x20] sm:$0xff]  ;;  %v3079_v15 = vpack.c.bf16 %v1504_v57, %v1500_v12 }
 0x29c   : > { %1188 = vrot.lane.b32.xlu0 %v3240_v5, %s3630_s15  ;;  %3048 = vmatprep.subr.bf16.mxu0 %v3047_v16  ;;  %v1135_v16 = vld [vmem:[%s4173_s27 + $0x38] sm:$0xff]  ;;  %v1517_v57 = vld [vmem:[#allocation7 + $0x1a0] sm:$0xff]  ;;  %s2606_s15 = sshll.u32 %s3719_s21, 11 }
 0x29d   : > { %s4804_s30 = scalar_lea.hbm %s5026_s11, %s2606_s15 }
 0x29f   : > { %3050 = vmatpush1.bf16.msra.mxu0 %v3049_v21 }
 0x2d6   : > { %v1161_v25 = vpop.permute.xlu0 %1160 }
 0x2d7   : > { %v1208_v27 = vmul.f32 %v1161_v25, %v1128_v23 }
 0x2d9   : > { %v1224_v29 = vadd.f32 %v1208_v27, %v4059_v26  ;;  %v1137_v27 = vld [vmem:[%s4173_s27 + $0x48] sm:$0xff] }
 0x2da   : > { %v1163_v36 = vpop.permute.xlu0 %1162 }
 0x2db   : > { %v1209_v39 = vmul.f32 %v1163_v36, %v1129_v28  ;;  %2895 = vmatprep.mubr.msk.f32.mxu1 %vm1255_vm0, %v1224_v29  ;;  %v1136_v28 = vld [vmem:[%s4173_s27 + $0x40] sm:$0xff] }
 0x2dd   : > { %v1225_v22 = vadd.f32 %v1209_v39, %v4056_v24  ;;  %v1487_v24 = vld [vmem:[#allocation7 + $0xb0] sm:$0xff] }
 0x2de   : > { %v1165_v47 = vpop.permute.xlu1 %1164  ;;  %v3073_v2 = vpack.c.bf16 %v1487_v24, %v1483_v56 }
 0x2df   : > { %v1210_v26 = vmul.f32 %v1165_v47, %v1130_v41  ;;  %2896 = vmatmul.mubr.msk.f32.vlgmr.msra.gmra.mrb[32].mxu1 %vm1255_vm0, %v1225_v22 }
 0x2e0   : > { %3066 = vmatpush1.bf16.msra.mxu1 %v3065_v42 }
 0x2e1   : > { %v1226_v54 = vadd.f32 %v1210_v26, %v4073_v34  ;;  %3068 = vmatprep.subr.bf16.mxu1 %v3067_v44 }
 0x2e2   : > { %v1167_v58 = vpop.permute.xlu1 %1166 }
 0x2e3   : > { %v1211_v61 = vmul.f32 %v1167_v58, %v1131_v51  ;;  %2898 = vmatprep.mubr.msk.f32.mxu1 %vm1255_vm0, %v1226_v54 }
 0x2e4   : > { %3070 = vmatpush1.bf16.msra.mxu1 %v3069_v52  ;;  %v1143_v52 = vld [vmem:[%s4173_s27 + $0x78] sm:$0xff] }
 0x2e5   : > { %v1227_v3 = vadd.f32 %v1211_v61, %v4070_v32  ;;  %3072 = vmatprep.subr.bf16.mxu1 %v3071_v55  ;;  %v3077_v32 = vpack.c.bf16 %v1495_v7, %v1491_v6  ;;  %v1510_v61 = vld [vmem:[#allocation7 + $0x168] sm:$0xff] }
 0x2e6   : > { %v1171_v5 = vpop.permute.xlu1 %1170  ;;  %v1169_v34 = vpop.permute.xlu0 %1168  ;;  %v1514_v7 = vld [vmem:[#allocation7 + $0x188] sm:$0xff] }
 0x2e7   : > { %v1213_v9 = vmul.f32 %v1171_v5, %v1133_v63  ;;  %v1212_v10 = vmul.f32 %v1169_v34, %v1132_v0  ;;  %2899 = vmatmul.mubr.msk.f32.gmra.mrb[34].mxu1 %vm1255_vm0, %v1227_v3  ;;  %v3051_v63 = vpack.c.bf16 %v1510_v61, %v1506_v60  ;;  %v1505_v0 = vld [vmem:[#allocation7 + $0x140] sm:$0xff]  ;;  %v1508_v3 = vld [vmem:[#allocation7 + $0x158] sm:$0xff]  ;;  %v1507_v34 = vld [vmem:[#allocation7 + $0x150] sm:$0xff] }
 0x2e8   : > { %3074 = vmatpush1.bf16.msra.mxu1 %v3073_v2  ;;  %v1509_v2 = vld [vmem:[#allocation7 + $0x160] sm:$0xff]  ;;  %v1512_v5 = vld [vmem:[#allocation7 + $0x178] sm:$0xff] }
 0x2e9   : > { %v1229_v13 = vadd.f32 %v1213_v9, %v4082_v40  ;;  %v1228_v14 = vadd.f32 %v1212_v10, %v4085_v43  ;;  %3076 = vmatprep.subr.bf16.mxu1 %v3075_v4  ;;  %v3053_v4 = vpack.c.bf16 %v1509_v2, %v1505_v0  ;;  %3052 = vmatprep.subr.bf16.mxu0 %v3051_v63  ;;  %v1518_v9 = vld [vmem:[#allocation7 + $0x1a8] sm:$0xff]  ;;  %v1513_v10 = vld [vmem:[#allocation7 + $0x180] sm:$0xff] }
 0x2ea   : > { %v3055_v12 = vpack.c.bf16 %v1518_v9, %v1514_v7 }
 0x2eb   : > { %2901 = vmatprep.mubr.msk.f32.mxu1 %vm1255_vm0, %v1228_v14  ;;  %3054 = vmatpush1.bf16.msra.mxu0 %v3053_v4  ;;  %v1520_v14 = vld [vmem:[#allocation7 + $0x1b8] sm:$0xff] }
 0x2ec   : > { %2902 = vmatmul.mubr.msk.f32.gmra.mrb[36].mxu1 %vm1255_vm0, %v1229_v13  ;;  %v1516_v13 = vld [vmem:[#allocation7 + $0x198] sm:$0xff]  ;;  %3056 = vmatprep.subr.bf16.mxu0 %v3055_v12 }
 0x2ed   : > { %v1175_v19 = vpop.permute.xlu1 %1174  ;;  %3078 = vmatpush1.bf16.msra.mxu1 %v3077_v32  ;;  %v3057_v32 = vpack.c.bf16 %v1517_v57, %v1513_v10 }
 0x2ee   : > { %v1215_v21 = vmul.f32 %v1175_v19, %v1135_v16  ;;  %v1173_v23 = vpop.permute.xlu0 %1172  ;;  %3080 = vmatprep.subr.bf16.mxu1 %v3079_v15  ;;  %v3087_v15 = vpack.c.bf16 %v1520_v14, %v1516_v13  ;;  %v1515_v16 = vld [vmem:[#allocation7 + $0x190] sm:$0xff] }
 0x2ef   : > { %v1214_v40 = vmul.f32 %v1173_v23, %v1134_v18  ;;  %v1519_v18 = vld [vmem:[#allocation7 + $0x1b0] sm:$0xff]  ;;  %3058 = vmatpush1.bf16.msra.mxu0 %v3057_v32  ;;  %v1526_v23 = vld [vmem:[#allocation7 + $0x1e8] sm:$0xff] }
 0x2f0   : > { %v1231_v25 = vadd.f32 %v1215_v21, %v4096_v50  ;;  %v1138_v50 = vld [vmem:[%s4173_s27 + $0x50] sm:$0xff]  ;;  %v3089_v19 = vpack.c.bf16 %v1519_v18, %v1515_v16  ;;  %v1522_v21 = vld [vmem:[#allocation7 + $0x1c8] sm:$0xff]  ;;  %v1531_v18 = vlaneseq }
 0x2f1   : > { %v1230_v43 = vadd.f32 %v1214_v40, %v4099_v53  ;;  %v1139_v53 = vld [vmem:[%s4173_s27 + $0x58] sm:$0xff] }
 0x2f2   : > { %v1524_v40 = vld [vmem:[#allocation7 + $0x1d8] sm:$0xff] }
 0x2f3   : > { %2904 = vmatprep.mubr.msk.f32.mxu1 %vm1255_vm0, %v1230_v43  ;;  %v3059_v43 = vpack.c.bf16 %v1526_v23, %v1522_v21  ;;  %v1529_v23 = vld [vmem:[%s5024_s9] sm:$0xf] }
 0x2f4   : > { %2905 = vmatmul.mubr.msk.f32.gmra.mrb[38].mxu1 %vm1255_vm0, %v1231_v25  ;;  %v1521_v25 = vld [vmem:[#allocation7 + $0x1c0] sm:$0xff] }
 0x2f5   : > { %v1179_v29 = vpop.permute.xlu1 %1178  ;;  %3060 = vmatprep.subr.bf16.mxu0 %v3059_v43 }
 0x2f6   : > { %v1217_v31 = vmul.f32 %v1179_v29, %v1137_v27  ;;  %v1177_v33 = vpop.permute.xlu0 %1176  ;;  %v1525_v27 = vld [vmem:[#allocation7 + $0x1e0] sm:$0xff] }
 0x2f7   : > { %v1216_v36 = vmul.f32 %v1177_v33, %v1136_v28  ;;  %v1528_v28 = vld [vmem:[#allocation7 + $0x1f8] sm:$0xff]  ;;  %v3061_v29 = vpack.c.bf16 %v1525_v27, %v1521_v25  ;;  %v1523_v33 = vld [vmem:[#allocation7 + $0x1d0] sm:$0xff] }
 0x2f8   : > { %v1233_v38 = vadd.f32 %v1217_v31, %v4110_v62  ;;  %v1140_v62 = vld [vmem:[%s4173_s27 + $0x60] sm:$0xff]  ;;  %v3091_v31 = vpack.c.bf16 %v1528_v28, %v1524_v40 }
 0x2f9   : > { %v1232_v37 = vadd.f32 %v1216_v36, %v4113_v1  ;;  %v1141_v1 = vld [vmem:[%s4173_s27 + $0x68] sm:$0xff]  ;;  %v1527_v36 = vld [vmem:[#allocation7 + $0x1f0] sm:$0xff]  ;;  %3062 = vmatpush1.bf16.msra.mxu0 %v3061_v29 }
 0x2fb   : > { %2907 = vmatprep.mubr.msk.f32.mxu1 %vm1255_vm0, %v1232_v37  ;;  %v3093_v37 = vpack.c.bf16 %v1527_v36, %v1523_v33 }
 0x2fc   : > { %2908 = vmatmul.mubr.msk.f32.gmra.mrb[40].mxu1 %vm1255_vm0, %v1233_v38  ;;  %v3631_v38 = vmov 0.0  }
 0x2fd   : > { %v1183_v39 = vpop.permute.xlu1 %1182  ;;  %1615 = vmatprep.mubr.f32.mxu0 %v3631_v38 }
 0x2fe   : > { %v1219_v41 = vmul.f32 %v1183_v39, %v1139_v53  ;;  %v1181_v42 = vpop.permute.xlu0 %1180  ;;  %v4228_v53 = vld [vmem:[%s5022_s7] ss:$0 sm:$0xff] }
 0x2ff   : > { %v1218_v22 = vmul.f32 %v1181_v42, %v1138_v50 }
 0x300   : > { %v1235_v45 = vadd.f32 %v1219_v41, %v4124_v8  ;;  %v1142_v8 = vld [vmem:[%s4173_s27 + $0x70] sm:$0xff]  ;;  %s2391_s27 = scalar_lea.sflag [#allocation10], %s3876_s12 }
 0x301   : > { %v1234_v44 = vadd.f32 %v1218_v22, %v4127_v11 }
 0x303   : > { %2910 = vmatprep.mubr.msk.f32.mxu1 %vm1255_vm0, %v1234_v44 }
 0x304   : > { %2911 = vmatmul.mubr.msk.f32.gmra.mrb[42].mxu1 %vm1255_vm0, %v1235_v45 }
 0x305   : > { %v1187_v46 = vpop.permute.xlu1 %1186 }
 0x306   : > { %v1221_v47 = vmul.f32 %v1187_v46, %v1141_v1  ;;  %v1185_v48 = vpop.permute.xlu0 %1184 }
 0x307   : > { %v1220_v49 = vmul.f32 %v1185_v48, %v1140_v62 }
 0x308   : > { %v1237_v51 = vadd.f32 %v1221_v47, %v4138_v17  ;;  %v1503_v17 = vld [vmem:[#allocation7 + $0x130] sm:$0xff] }
 0x309   : > { %v1236_v26 = vadd.f32 %v1220_v49, %v4141_v20  ;;  %v1499_v20 = vld [vmem:[#allocation7 + $0x110] sm:$0xff] }
 0x30a   : > { %v3081_v59 = vpack.c.bf16 %v1503_v17, %v1499_v20 }
 0x30b   : > { %2913 = vmatprep.mubr.msk.f32.mxu1 %vm1255_vm0, %v1236_v26 }
 0x30c   : > { %2914 = vmatmul.mubr.msk.f32.gmra.mrb[44].mxu1 %vm1255_vm0, %v1237_v51 }
 0x30d   : > { %v1191_v11 = vpop.permute.xlu1 %1190  ;;  %3082 = vmatpush1.bf16.msra.mxu1 %v3081_v59 }
 0x30e   : > { %v1223_v54 = vmul.f32 %v1191_v11, %v1143_v52  ;;  %v1189_v55 = vpop.permute.xlu0 %1188 }
 0x30f   : > { %v1222_v56 = vmul.f32 %v1189_v55, %v1142_v8 }
 0x310   : > { %v1239_v58 = vadd.f32 %v1223_v54, %v4152_v30  ;;  %v3083_v30 = vpack.c.bf16 %v1512_v5, %v1508_v3 }
 0x311   : > { %v1238_v24 = vadd.f32 %v1222_v56, %v4155_v35  ;;  %v1511_v35 = vld [vmem:[#allocation7 + $0x170] sm:$0xff] }
 0x312   : > { %v3085_v6 = vpack.c.bf16 %v1511_v35, %v1507_v34  ;;  %3084 = vmatprep.subr.bf16.mxu1 %v3083_v30 }
 0x313   : > { %2916 = vmatprep.mubr.msk.f32.mxu1 %vm1255_vm0, %v1238_v24 }
 0x314   : > { %2917 = vmatmul.mubr.msk.f32.gmra.mrb[46].mxu1 %vm1255_vm0, %v1239_v58 }
 0x315   : > { %3086 = vmatpush1.bf16.msra.mxu1 %v3085_v6  ;;  %1776 = vmatprep.mubr.f32.mxu1 %v3631_v38 }
 0x316   : > { %3088 = vmatprep.subr.bf16.mxu1 %v3087_v15 }
 0x319   : > { %3090 = vmatpush1.bf16.msra.mxu1 %v3089_v19  ;;  %v1532_v19 = vshrl.u32 %v1531_v18, 7 }
 0x31a   : > { %3092 = vmatprep.subr.bf16.mxu1 %v3091_v31 }
 0x31b   : > { %v1533_v21 = vsub.s32 0, %v1532_v19  ;;  %v1537_v40 = vsub.s32 1, %v1532_v19  ;;  %v1541_v43 = vsub.s32 2, %v1532_v19  ;;  %v1545_v28 = vsub.s32 3, %v1532_v19 }
 0x31d   : > { %3094 = vmatpush1.bf16.msra.mxu1 %v3093_v37  ;;  %v4279_v25 = vrot.slane %v1529_v23, %v1533_v21  ;;  %v4281_v27 = vrot.slane %v1529_v23, %v1537_v40  ;;  %v4283_v31 = vrot.slane %v1529_v23, %v1541_v43 }
 0x3b2   : > { %v2897_v50 = vpop.f32.mrb[32].mxu1 }
 0x3b3   : > { %v1370_v39 = vpop.f32.mrb[33].mxu1  ;;  %v1376_v42 = vadd.f32 %v2897_v50, %v4228_v53  ;;  %v4291_v50 = vrot.slane %v1529_v23, %v1545_v28 }
 0x3b4   : > { %v1371_v41 = vadd.f32 %v4228_v53, %v1370_v39 }
 0x3b6   : > { %3241 = vtanh.f32 %v1371_v41 }
 0x3b7   : > { %3243 = vtanh.f32 %v1376_v42 }
 0x3ba   : > { %v2900_v22 = vpop.f32.mrb[34].mxu1 }
 0x3bb   : > { %v1380_v44 = vpop.f32.mrb[35].mxu1  ;;  %v1386_v1 = vadd.f32 %v2900_v22, %v4228_v53 }
 0x3bc   : > { %v1381_v45 = vadd.f32 %v4228_v53, %v1380_v44 }
 0x3be   : > { %3245 = vtanh.f32 %v1381_v45 }
 0x3bf   : > { %v2903_v62 = vpop.f32.mrb[36].mxu1  ;;  %3247 = vtanh.f32 %v1386_v1 }
 0x3c0   : > { %v3242_v46 = vpop.eup %3241  ;;  %v1390_v47 = vpop.f32.mrb[37].mxu1  ;;  %v1396_v26 = vadd.f32 %v2903_v62, %v4228_v53 }
 0x3c1   : > { %1616 = vmatmul.mubr.f32.vlgmr.msra.gmra.mrb[48].mxu0 %v3242_v46  ;;  %1777 = vmatmul.mubr.f32.vlgmr.msra.gmra.mrb[48].mxu1 %v3242_v46  ;;  %v1391_v48 = vadd.f32 %v4228_v53, %v1390_v47  ;;  %v3244_v49 = vpop.eup %3243 }
 0x3c2   : > { %1621 = vmatprep.mubr.f32.mxu0 %v3631_v38  ;;  %1782 = vmatprep.mubr.f32.mxu1 %v3631_v38 }
 0x3c3   : > { %3249 = vtanh.f32 %v1391_v48 }
 0x3c4   : > { %3251 = vtanh.f32 %v1396_v26 }
 0x3c5   : > { %1622 = vmatmul.mubr.f32.gmra.mrb[50].mxu0 %v3244_v49  ;;  %1783 = vmatmul.mubr.f32.gmra.mrb[50].mxu1 %v3244_v49 }
 0x3c6   : > { %1627 = vmatprep.mubr.f32.mxu0 %v3631_v38  ;;  %1788 = vmatprep.mubr.f32.mxu1 %v3631_v38 }
 0x3c7   : > { %v2906_v51 = vpop.f32.mrb[38].mxu1 }
 0x3c8   : > { %v3246_v52 = vpop.eup %3245  ;;  %v1400_v8 = vpop.f32.mrb[39].mxu1  ;;  %v1406_v55 = vadd.f32 %v2906_v51, %v4228_v53 }
 0x3c9   : > { %1628 = vmatmul.mubr.f32.gmra.mrb[52].mxu0 %v3246_v52  ;;  %1789 = vmatmul.mubr.f32.gmra.mrb[52].mxu1 %v3246_v52  ;;  %v1401_v11 = vadd.f32 %v4228_v53, %v1400_v8  ;;  %v3248_v54 = vpop.eup %3247 }
 0x3ca   : > { %1633 = vmatprep.mubr.f32.mxu0 %v3631_v38  ;;  %1794 = vmatprep.mubr.f32.mxu1 %v3631_v38 }
 0x3cb   : > { %3253 = vtanh.f32 %v1401_v11 }
 0x3cc   : > { %3255 = vtanh.f32 %v1406_v55 }
 0x3cd   : > { %1634 = vmatmul.mubr.f32.gmra.mrb[54].mxu0 %v3248_v54  ;;  %1795 = vmatmul.mubr.f32.gmra.mrb[54].mxu1 %v3248_v54  ;;  %v3250_v24 = vpop.eup %3249 }
 0x3ce   : > { %1639 = vmatprep.mubr.f32.mxu0 %v3631_v38  ;;  %1800 = vmatprep.mubr.f32.mxu1 %v3631_v38  ;;  %v3252_v17 = vpop.eup %3251 }
 0x3cf   : > { %v2909_v56 = vpop.f32.mrb[40].mxu1 }
 0x3d0   : > { %v1410_v58 = vpop.f32.mrb[41].mxu1  ;;  %v1416_v59 = vadd.f32 %v2909_v56, %v4228_v53 }
 0x3d1   : > { %1640 = vmatmul.mubr.f32.gmra.mrb[56].mxu0 %v3250_v24  ;;  %1801 = vmatmul.mubr.f32.gmra.mrb[56].mxu1 %v3250_v24  ;;  %v1411_v20 = vadd.f32 %v4228_v53, %v1410_v58 }
 0x3d2   : > { %1645 = vmatprep.mubr.f32.mxu0 %v3631_v38  ;;  %1806 = vmatprep.mubr.f32.mxu1 %v3631_v38 }
 0x3d3   : > { %3257 = vtanh.f32 %v1411_v20 }
 0x3d4   : > { %3259 = vtanh.f32 %v1416_v59 }
 0x3d5   : > { %1646 = vmatmul.mubr.f32.gmra.mrb[58].mxu0 %v3252_v17  ;;  %1807 = vmatmul.mubr.f32.gmra.mrb[58].mxu1 %v3252_v17  ;;  %v3254_v61 = vpop.eup %3253 }
 0x3d6   : > { %1651 = vmatprep.mubr.f32.mxu0 %v3631_v38  ;;  %1812 = vmatprep.mubr.f32.mxu1 %v3631_v38  ;;  %v3256_v2 = vpop.eup %3255 }
 0x3d7   : > { %v2912_v60 = vpop.f32.mrb[42].mxu1 }
 0x3d8   : > { %v1420_v63 = vpop.f32.mrb[43].mxu1  ;;  %v1426_v3 = vadd.f32 %v2912_v60, %v4228_v53 }
 0x3d9   : > { %1652 = vmatmul.mubr.f32.gmra.mrb[60].mxu0 %v3254_v61  ;;  %1813 = vmatmul.mubr.f32.gmra.mrb[60].mxu1 %v3254_v61  ;;  %v1421_v0 = vadd.f32 %v4228_v53, %v1420_v63 }
 0x3da   : > { %1657 = vmatprep.mubr.f32.mxu0 %v3631_v38  ;;  %1818 = vmatprep.mubr.f32.mxu1 %v3631_v38 }
 0x3db   : > { %3261 = vtanh.f32 %v1421_v0 }
 0x3dc   : > { %3263 = vtanh.f32 %v1426_v3 }
 0x3dd   : > { %1658 = vmatmul.mubr.f32.gmra.mrb[62].mxu0 %v3256_v2  ;;  %1819 = vmatmul.mubr.f32.gmra.mrb[62].mxu1 %v3256_v2  ;;  %v3258_v5 = vpop.eup %3257 }
 0x3de   : > { %1663 = vmatprep.mubr.f32.mxu0 %v3631_v38  ;;  %1824 = vmatprep.mubr.f32.mxu1 %v3631_v38  ;;  %v3260_v30 = vpop.eup %3259 }
 0x3df   : > { %v2915_v4 = vpop.f32.mrb[44].mxu1 }
 0x3e0   : > { %v1430_v34 = vpop.f32.mrb[45].mxu1  ;;  %v1436_v6 = vadd.f32 %v2915_v4, %v4228_v53 }
 0x3e1   : > { %1664 = vmatmul.mubr.f32.gmra.mrb[64].mxu0 %v3258_v5  ;;  %1825 = vmatmul.mubr.f32.gmra.mrb[64].mxu1 %v3258_v5  ;;  %v1431_v35 = vadd.f32 %v4228_v53, %v1430_v34 }
 0x3e2   : > { %1669 = vmatprep.mubr.f32.mxu0 %v3631_v38  ;;  %1830 = vmatprep.mubr.f32.mxu1 %v3631_v38 }
 0x3e3   : > { %3265 = vtanh.f32 %v1431_v35 }
 0x3e4   : > { %3267 = vtanh.f32 %v1436_v6 }
 0x3e5   : > { %1670 = vmatmul.mubr.f32.gmra.mrb[66].mxu0 %v3260_v30  ;;  %1831 = vmatmul.mubr.f32.gmra.mrb[66].mxu1 %v3260_v30  ;;  %v3262_v9 = vpop.eup %3261 }
 0x3e6   : > { %1675 = vmatprep.mubr.f32.mxu0 %v3631_v38  ;;  %1836 = vmatprep.mubr.f32.mxu1 %v3631_v38  ;;  %v3264_v57 = vpop.eup %3263 }
 0x3e7   : > { %v2918_v7 = vpop.f32.mrb[46].mxu1 }
 0x3e8   : > { %v1440_v10 = vpop.f32.mrb[47].mxu1  ;;  %v1446_v13 = vadd.f32 %v2918_v7, %v4228_v53 }
 0x3e9   : > { %1676 = vmatmul.mubr.f32.gmra.mrb[68].mxu0 %v3262_v9  ;;  %1837 = vmatmul.mubr.f32.gmra.mrb[68].mxu1 %v3262_v9  ;;  %v1441_v12 = vadd.f32 %v4228_v53, %v1440_v10 }
 0x3ea   : > { %1681 = vmatprep.mubr.f32.mxu0 %v3631_v38  ;;  %1842 = vmatprep.mubr.f32.mxu1 %v3631_v38 }
 0x3eb   : > { %3269 = vtanh.f32 %v1441_v12 }
 0x3ec   : > { %3271 = vtanh.f32 %v1446_v13 }
 0x3ed   : > { %1682 = vmatmul.mubr.f32.gmra.mrb[70].mxu0 %v3264_v57  ;;  %1843 = vmatmul.mubr.f32.gmra.mrb[70].mxu1 %v3264_v57  ;;  %v3266_v14 = vpop.eup %3265 }
 0x3ee   : > { %1687 = vmatprep.mubr.f32.mxu0 %v3631_v38  ;;  %1848 = vmatprep.mubr.f32.mxu1 %v3631_v38  ;;  %v3268_v32 = vpop.eup %3267 }
 0x3f1   : > { %1688 = vmatmul.mubr.f32.gmra.mrb[72].mxu0 %v3266_v14  ;;  %1849 = vmatmul.mubr.f32.gmra.mrb[72].mxu1 %v3266_v14 }
 0x3f2   : > { %1693 = vmatprep.mubr.f32.mxu0 %v3631_v38  ;;  %1854 = vmatprep.mubr.f32.mxu1 %v3631_v38 }
 0x3f5   : > { %1694 = vmatmul.mubr.f32.gmra.mrb[74].mxu0 %v3268_v32  ;;  %1855 = vmatmul.mubr.f32.gmra.mrb[74].mxu1 %v3268_v32  ;;  %v3270_v15 = vpop.eup %3269 }
 0x3f6   : > { %1699 = vmatprep.mubr.f32.mxu0 %v3631_v38  ;;  %1860 = vmatprep.mubr.f32.mxu1 %v3631_v38  ;;  %v3272_v16 = vpop.eup %3271 }
 0x3f9   : > { %1700 = vmatmul.mubr.f32.gmra.mrb[76].mxu0 %v3270_v15  ;;  %1861 = vmatmul.mubr.f32.gmra.mrb[76].mxu1 %v3270_v15 }
 0x3fa   : > { %1705 = vmatprep.mubr.f32.mxu0 %v3631_v38  ;;  %1866 = vmatprep.mubr.f32.mxu1 %v3631_v38 }
 0x3fd   : > { %1706 = vmatmul.mubr.f32.gmra.mrb[78].mxu0 %v3272_v16  ;;  %1867 = vmatmul.mubr.f32.gmra.mrb[78].mxu1 %v3272_v16 }
 0x494   : > { %v1617_v29 = vpop.f32.mrb[48].mxu0  ;;  %v1778_v33 = vpop.f32.mrb[48].mxu1 }
 0x495   : > { %v4286_v36 = vadd.f32 %v1617_v29, %v4279_v25  ;;  %v1619_v37 = vpop.f32.mrb[49].mxu0  ;;  %v1780_v38 = vpop.f32.mrb[49].mxu1  ;;  %v4294_v39 = vadd.f32 %v1778_v33, %v4283_v31 }
 0x496   : > { %v4289_v53 = vadd.f32 %v1619_v37, %v4281_v27  ;;  %v4302_v62 = vadd.f32 %v1780_v38, %v4291_v50 }
 0x498   : > { %v1873_v41 = vmax.f32 %v4286_v36, %v4289_v53  ;;  %v1623_v42 = vpop.f32.mrb[50].mxu0  ;;  %v1784_v22 = vpop.f32.mrb[50].mxu1 }
 0x499   : > { %v4299_v44 = vadd.f32 %v1623_v42, %v4279_v25  ;;  %v1625_v45 = vpop.f32.mrb[51].mxu0  ;;  %v1786_v1 = vpop.f32.mrb[51].mxu1  ;;  %v4309_v48 = vadd.f32 %v1784_v22, %v4283_v31 }
 0x49a   : > { %v4305_v46 = vadd.f32 %v1625_v45, %v4281_v27  ;;  %v1874_v47 = vmax.f32 %v1873_v41, %v4294_v39  ;;  %v4318_v55 = vadd.f32 %v1786_v1, %v4291_v50 }
 0x49c   : > { %v1878_v49 = vmax.f32 %v4299_v44, %v4305_v46  ;;  %v1629_v26 = vpop.f32.mrb[52].mxu0  ;;  %v1790_v51 = vpop.f32.mrb[52].mxu1  ;;  %v1875_v52 = vmax.f32 %v1874_v47, %v4302_v62 }
 0x49d   : > { %v4315_v8 = vadd.f32 %v1629_v26, %v4279_v25  ;;  %v1631_v11 = vpop.f32.mrb[53].mxu0  ;;  %v1792_v54 = vpop.f32.mrb[53].mxu1  ;;  %v4325_v58 = vadd.f32 %v1790_v51, %v4283_v31 }
 0x49e   : > { %v4321_v56 = vadd.f32 %v1631_v11, %v4281_v27  ;;  %1876 = vmax.xlane.f32.xlu0 %v1875_v52  ;;  %v1879_v24 = vmax.f32 %v1878_v49, %v4309_v48  ;;  %v4334_v2 = vadd.f32 %v1792_v54, %v4291_v50 }
 0x4a0   : > { %v1883_v20 = vmax.f32 %v4315_v8, %v4321_v56  ;;  %v1635_v17 = vpop.f32.mrb[54].mxu0  ;;  %v1796_v59 = vpop.f32.mrb[54].mxu1  ;;  %v1880_v60 = vmax.f32 %v1879_v24, %v4318_v55 }
 0x4a1   : > { %v4331_v61 = vadd.f32 %v1635_v17, %v4279_v25  ;;  %v1637_v63 = vpop.f32.mrb[55].mxu0  ;;  %v1798_v0 = vpop.f32.mrb[55].mxu1  ;;  %v4341_v5 = vadd.f32 %v1796_v59, %v4283_v31 }
 0x4a2   : > { %v4337_v3 = vadd.f32 %v1637_v63, %v4281_v27  ;;  %1881 = vmax.xlane.f32.xlu1 %v1880_v60  ;;  %v1884_v4 = vmax.f32 %v1883_v20, %v4325_v58  ;;  %v4350_v12 = vadd.f32 %v1798_v0, %v4291_v50 }
 0x4a4   : > { %v1888_v34 = vmax.f32 %v4331_v61, %v4337_v3  ;;  %v1641_v35 = vpop.f32.mrb[56].mxu0  ;;  %v1802_v30 = vpop.f32.mrb[56].mxu1  ;;  %v1885_v6 = vmax.f32 %v1884_v4, %v4334_v2 }
 0x4a5   : > { %v4347_v7 = vadd.f32 %v1641_v35, %v4279_v25  ;;  %v1643_v9 = vpop.f32.mrb[57].mxu0  ;;  %v1804_v10 = vpop.f32.mrb[57].mxu1  ;;  %v4357_v14 = vadd.f32 %v1802_v30, %v4283_v31 }
 0x4a6   : > { %v4353_v57 = vadd.f32 %v1643_v9, %v4281_v27  ;;  %1886 = vmax.xlane.f32.xlu0 %v1885_v6  ;;  %v1889_v13 = vmax.f32 %v1888_v34, %v4341_v5  ;;  %v4366_v40 = vadd.f32 %v1804_v10, %v4291_v50 }
 0x4a8   : > { %v1893_v32 = vmax.f32 %v4347_v7, %v4353_v57  ;;  %v1647_v15 = vpop.f32.mrb[58].mxu0  ;;  %v1808_v16 = vpop.f32.mrb[58].mxu1  ;;  %v1890_v18 = vmax.f32 %v1889_v13, %v4350_v12 }
 0x4a9   : > { %v4363_v19 = vadd.f32 %v1647_v15, %v4279_v25  ;;  %v1649_v21 = vpop.f32.mrb[59].mxu0  ;;  %v1810_v23 = vpop.f32.mrb[59].mxu1  ;;  %v4373_v29 = vadd.f32 %v1808_v16, %v4283_v31 }
 0x4aa   : > { %v4369_v43 = vadd.f32 %v1649_v21, %v4281_v27  ;;  %1891 = vmax.xlane.f32.xlu0 %v1890_v18  ;;  %v1894_v28 = vmax.f32 %v1893_v32, %v4357_v14  ;;  %v4382_v1 = vadd.f32 %v1810_v23, %v4291_v50 }
 0x4ac   : > { %v1898_v33 = vmax.f32 %v4363_v19, %v4369_v43  ;;  %v1653_v37 = vpop.f32.mrb[60].mxu0  ;;  %v1814_v38 = vpop.f32.mrb[60].mxu1  ;;  %v1895_v41 = vmax.f32 %v1894_v28, %v4366_v40 }
 0x4ad   : > { %v4379_v42 = vadd.f32 %v1653_v37, %v4279_v25  ;;  %v1655_v22 = vpop.f32.mrb[61].mxu0  ;;  %v1816_v45 = vpop.f32.mrb[61].mxu1  ;;  %v4389_v26 = vadd.f32 %v1814_v38, %v4283_v31 }
 0x4ae   : > { %v4385_v47 = vadd.f32 %v1655_v22, %v4281_v27  ;;  %1896 = vmax.xlane.f32.xlu1 %v1895_v41  ;;  %v1899_v49 = vmax.f32 %v1898_v33, %v4373_v29  ;;  %v4398_v59 = vadd.f32 %v1816_v45, %v4291_v50 }
 0x4b0   : > { %v1903_v51 = vmax.f32 %v4379_v42, %v4385_v47  ;;  %v1659_v52 = vpop.f32.mrb[62].mxu0  ;;  %v1820_v11 = vpop.f32.mrb[62].mxu1  ;;  %v1900_v54 = vmax.f32 %v1899_v49, %v4382_v1 }
 0x4b1   : > { %v4395_v24 = vadd.f32 %v1659_v52, %v4279_v25  ;;  %v1661_v20 = vpop.f32.mrb[63].mxu0  ;;  %v1822_v17 = vpop.f32.mrb[63].mxu1  ;;  %v4405_v0 = vadd.f32 %v1820_v11, %v4283_v31 }
 0x4b2   : > { %v4401_v60 = vadd.f32 %v1661_v20, %v4281_v27  ;;  %1901 = vmax.xlane.f32.xlu0 %v1900_v54  ;;  %v1904_v63 = vmax.f32 %v1903_v51, %v4389_v26  ;;  %v4414_v13 = vadd.f32 %v1822_v17, %v4291_v50 }
 0x4b4   : > { %v1908_v4 = vmax.f32 %v4395_v24, %v4401_v60  ;;  %v1665_v34 = vpop.f32.mrb[64].mxu0  ;;  %v1826_v35 = vpop.f32.mrb[64].mxu1  ;;  %v1905_v30 = vmax.f32 %v1904_v63, %v4398_v59 }
 0x4b5   : > { %v4411_v6 = vadd.f32 %v1665_v34, %v4279_v25  ;;  %v1667_v9 = vpop.f32.mrb[65].mxu0  ;;  %v1828_v10 = vpop.f32.mrb[65].mxu1  ;;  %v4421_v16 = vadd.f32 %v1826_v35, %v4283_v31 }
 0x4b6   : > { %v4417_v32 = vadd.f32 %v1667_v9, %v4281_v27  ;;  %1906 = vmax.xlane.f32.xlu1 %v1905_v30  ;;  %v1909_v15 = vmax.f32 %v1908_v4, %v4405_v0  ;;  %v4430_v41 = vadd.f32 %v1828_v10, %v4291_v50 }
 0x4b8   : > { %v1913_v18 = vmax.f32 %v4411_v6, %v4417_v32  ;;  %v1671_v21 = vpop.f32.mrb[66].mxu0  ;;  %v1832_v23 = vpop.f32.mrb[66].mxu1  ;;  %v1910_v28 = vmax.f32 %v1909_v15, %v4414_v13 }
 0x4b9   : > { %v4427_v33 = vadd.f32 %v1671_v21, %v4279_v25  ;;  %v1673_v37 = vpop.f32.mrb[67].mxu0  ;;  %v1834_v38 = vpop.f32.mrb[67].mxu1  ;;  %v4437_v49 = vadd.f32 %v1832_v23, %v4283_v31 }
 0x4ba   : > { %v4433_v22 = vadd.f32 %v1673_v37, %v4281_v27  ;;  %1911 = vmax.xlane.f32.xlu0 %v1910_v28  ;;  %v1914_v45 = vmax.f32 %v1913_v18, %v4421_v16  ;;  %v4446_v4 = vadd.f32 %v1834_v38, %v4291_v50 }
 0x4bc   : > { %v1918_v51 = vmax.f32 %v4427_v33, %v4433_v22  ;;  %v1677_v52 = vpop.f32.mrb[68].mxu0  ;;  %v1838_v11 = vpop.f32.mrb[68].mxu1  ;;  %v1915_v54 = vmax.f32 %v1914_v45, %v4430_v41 }
 0x4bd   : > { %v4443_v20 = vadd.f32 %v1677_v52, %v4279_v25  ;;  %v1679_v17 = vpop.f32.mrb[69].mxu0  ;;  %v1840_v63 = vpop.f32.mrb[69].mxu1  ;;  %v4453_v30 = vadd.f32 %v1838_v11, %v4283_v31 }
 0x4be   : > { %v4449_v34 = vadd.f32 %v1679_v17, %v4281_v27  ;;  %1916 = vmax.xlane.f32.xlu1 %v1915_v54  ;;  %v1919_v35 = vmax.f32 %v1918_v51, %v4437_v49  ;;  %v4462_v37 = vadd.f32 %v1840_v63, %v4291_v50 }
 0x4bf   : > { %5073 = vst [vmem:[#allocation17_spill] sm:$0xff] %v4453_v30 }
 0x4c0   : > { %v1923_v9 = vmax.f32 %v4443_v20, %v4449_v34  ;;  %v1683_v10 = vpop.f32.mrb[70].mxu0  ;;  %v1844_v15 = vpop.f32.mrb[70].mxu1  ;;  %v1920_v18 = vmax.f32 %v1919_v35, %v4446_v4  ;;  %5075 = vst [vmem:[#allocation19_spill] sm:$0xff] %v4462_v37 }
 0x4c1   : > { %v4459_v21 = vadd.f32 %v1683_v10, %v4279_v25  ;;  %v1685_v23 = vpop.f32.mrb[71].mxu0  ;;  %v1846_v28 = vpop.f32.mrb[71].mxu1  ;;  %v4469_v51 = vadd.f32 %v1844_v15, %v4283_v31 }
 0x4c2   : > { %v4465_v38 = vadd.f32 %v1685_v23, %v4281_v27  ;;  %1921 = vmax.xlane.f32.xlu0 %v1920_v18  ;;  %v1924_v45 = vmax.f32 %v1923_v9, %v4453_v30  ;;  %v4478_v23 = vadd.f32 %v1846_v28, %v4291_v50 }
 0x4c3   : > { %5074 = vst [vmem:[#allocation18_spill] sm:$0xff] %v4459_v21  ;;  %5077 = vst [vmem:[#allocation21_spill] sm:$0xff] %v4469_v51 }
 0x4c4   : > { %5076 = vst [vmem:[#allocation20_spill] sm:$0xff] %v4465_v38  ;;  %v1928_v52 = vmax.f32 %v4459_v21, %v4465_v38  ;;  %v1689_v11 = vpop.f32.mrb[72].mxu0  ;;  %v1850_v54 = vpop.f32.mrb[72].mxu1  ;;  %v1925_v17 = vmax.f32 %v1924_v45, %v4462_v37  ;;  %5079 = vst [vmem:[#allocation23_spill] sm:$0xff] %v4478_v23 }
 0x4c5   : > { %v4475_v35 = vadd.f32 %v1689_v11, %v4279_v25  ;;  %v1691_v63 = vpop.f32.mrb[73].mxu0  ;;  %v1852_v10 = vpop.f32.mrb[73].mxu1  ;;  %v4485_v18 = vadd.f32 %v1850_v54, %v4283_v31 }
 0x4c6   : > { %v4481_v9 = vadd.f32 %v1691_v63, %v4281_v27  ;;  %1926 = vmax.xlane.f32.xlu1 %v1925_v17  ;;  %v1929_v15 = vmax.f32 %v1928_v52, %v4469_v51  ;;  %v4494_v63 = vadd.f32 %v1852_v10, %v4291_v50 }
 0x4c7   : > { %5078 = vst [vmem:[#allocation22_spill] sm:$0xff] %v4475_v35  ;;  %5081 = vst [vmem:[#allocation25_spill] sm:$0xff] %v4485_v18 }
 0x4c8   : > { %5080 = vst [vmem:[#allocation24_spill] sm:$0xff] %v4481_v9  ;;  %v1933_v45 = vmax.f32 %v4475_v35, %v4481_v9  ;;  %v1695_v38 = vpop.f32.mrb[74].mxu0  ;;  %v1856_v11 = vpop.f32.mrb[74].mxu1  ;;  %v1930_v21 = vmax.f32 %v1929_v15, %v4478_v23  ;;  %5083 = vst [vmem:[#allocation27_spill] sm:$0xff] %v4494_v63 }
 0x4c9   : > { %v4491_v37 = vadd.f32 %v1695_v38, %v4279_v25  ;;  %v1697_v28 = vpop.f32.mrb[75].mxu0  ;;  %v1858_v30 = vpop.f32.mrb[75].mxu1  ;;  %v4501_v17 = vadd.f32 %v1856_v11, %v4283_v31 }
 0x4ca   : > { %v4497_v52 = vadd.f32 %v1697_v28, %v4281_v27  ;;  %1931 = vmax.xlane.f32.xlu0 %v1930_v21  ;;  %v1934_v54 = vmax.f32 %v1933_v45, %v4485_v18  ;;  %v4510_v28 = vadd.f32 %v1858_v30, %v4291_v50 }
 0x4cb   : > { %5082 = vst [vmem:[#allocation26_spill] sm:$0xff] %v4491_v37 }
 0x4cc   : > { %5084 = vst [vmem:[#allocation28_spill] sm:$0xff] %v4497_v52  ;;  %v1938_v15 = vmax.f32 %v4491_v37, %v4497_v52  ;;  %v1701_v9 = vpop.f32.mrb[76].mxu0  ;;  %v1862_v38 = vpop.f32.mrb[76].mxu1  ;;  %v1935_v35 = vmax.f32 %v1934_v54, %v4494_v63 }
 0x4cd   : > { %v4507_v23 = vadd.f32 %v1701_v9, %v4279_v25  ;;  %v1703_v10 = vpop.f32.mrb[77].mxu0  ;;  %v1864_v51 = vpop.f32.mrb[77].mxu1  ;;  %v4517_v11 = vadd.f32 %v1862_v38, %v4283_v31 }
 0x4ce   : > { %v4513_v21 = vadd.f32 %v1703_v10, %v4281_v27  ;;  %1936 = vmax.xlane.f32.xlu1 %v1935_v35  ;;  %v1939_v45 = vmax.f32 %v1938_v15, %v4501_v17  ;;  %v4526_v10 = vadd.f32 %v1864_v51, %v4291_v50 }
 0x4d0   : > { %v1943_v54 = vmax.f32 %v4507_v23, %v4513_v21  ;;  %v1707_v52 = vpop.f32.mrb[78].mxu0  ;;  %v1868_v9 = vpop.f32.mrb[78].mxu1  ;;  %v1940_v37 = vmax.f32 %v1939_v45, %v4510_v28 }
 0x4d1   : > { %v4523_v63 = vadd.f32 %v1707_v52, %v4279_v25  ;;  %v1709_v30 = vpop.f32.mrb[79].mxu0  ;;  %v1870_v18 = vpop.f32.mrb[79].mxu1  ;;  %v4533_v38 = vadd.f32 %v1868_v9, %v4283_v31 }
 0x4d2   : > { %v4529_v35 = vadd.f32 %v1709_v30, %v4281_v27  ;;  %1941 = vmax.xlane.f32.xlu0 %v1940_v37  ;;  %v1944_v15 = vmax.f32 %v1943_v54, %v4517_v11  ;;  %v4539_v52 = vadd.f32 %v1870_v18, %v4291_v50 }
 0x4d3   : > { %5085 = vst [vmem:[#allocation29_spill] sm:$0xff] %v4523_v63 }
 0x4d4   : > { %5086 = vst [vmem:[#allocation30_spill] sm:$0xff] %v4529_v35  ;;  %v1948_v45 = vmax.f32 %v4523_v63, %v4529_v35  ;;  %v1945_v25 = vmax.f32 %v1944_v15, %v4526_v10 }
 0x4d6   : > { %1946 = vmax.xlane.f32.xlu1 %v1945_v25  ;;  %v1949_v51 = vmax.f32 %v1948_v45, %v4533_v38 }
 0x4d8   : > { %v1950_v27 = vmax.f32 %v1949_v51, %v4539_v52 }
 0x4da   : > { %1951 = vmax.xlane.f32.xlu0 %v1950_v27 }
 0x52b   : > { %v1877_v37 = vpop.xlane.xlu0 %1876 }
 0x52c   : > { %v1953_v54 = vsub.f32 %v4286_v36, %v1877_v37  ;;  %v1954_v31 = vsub.f32 %v4289_v53, %v1877_v37  ;;  %v1955_v9 = vsub.f32 %v4294_v39, %v1877_v37  ;;  %v1956_v30 = vsub.f32 %v4302_v62, %v1877_v37 }
 0x52e   : > { %v2017_v35 = vmul.f32 1.442695, %v1953_v54  ;;  %v2019_v15 = vmul.f32 1.442695, %v1954_v31  ;;  %v2021_v63 = vmul.f32 1.442695, %v1955_v9 }
 0x52f   : > { %v2023_v50 = vmul.f32 1.442695, %v1956_v30  ;;  %v1882_v18 = vpop.xlane.xlu1 %1881 }
 0x530   : > { %3273 = vpow2.f32 %v2017_v35  ;;  %v1957_v45 = vsub.f32 %v4299_v44, %v1882_v18  ;;  %v1958_v25 = vsub.f32 %v4305_v46, %v1882_v18  ;;  %v1959_v51 = vsub.f32 %v4309_v48, %v1882_v18 }
 0x531   : > { %3275 = vpow2.f32 %v2019_v15  ;;  %v1960_v36 = vsub.f32 %v4318_v55, %v1882_v18 }
 0x532   : > { %3277 = vpow2.f32 %v2021_v63  ;;  %v2025_v53 = vmul.f32 1.442695, %v1957_v45  ;;  %v2027_v39 = vmul.f32 1.442695, %v1958_v25  ;;  %v2029_v27 = vmul.f32 1.442695, %v1959_v51 }
 0x533   : > { %3279 = vpow2.f32 %v2023_v50  ;;  %v2031_v62 = vmul.f32 1.442695, %v1960_v36  ;;  %v1887_v37 = vpop.xlane.xlu0 %1886 }
 0x534   : > { %3281 = vpow2.f32 %v2025_v53  ;;  %v1961_v54 = vsub.f32 %v4315_v8, %v1887_v37  ;;  %v1962_v35 = vsub.f32 %v4321_v56, %v1887_v37  ;;  %v1963_v44 = vsub.f32 %v4325_v58, %v1887_v37 }
 0x535   : > { %3283 = vpow2.f32 %v2027_v39  ;;  %v1964_v46 = vsub.f32 %v4334_v2, %v1887_v37 }
 0x536   : > { %3285 = vpow2.f32 %v2029_v27  ;;  %v2033_v48 = vmul.f32 1.442695, %v1961_v54  ;;  %v2035_v55 = vmul.f32 1.442695, %v1962_v35  ;;  %v2037_v63 = vmul.f32 1.442695, %v1963_v44 }
 0x537   : > { %3287 = vpow2.f32 %v2031_v62  ;;  %v2039_v31 = vmul.f32 1.442695, %v1964_v46  ;;  %v1892_v9 = vpop.xlane.xlu0 %1891 }
 0x538   : > { %3289 = vpow2.f32 %v2033_v48  ;;  %v1965_v30 = vsub.f32 %v4331_v61, %v1892_v9  ;;  %v1966_v15 = vsub.f32 %v4337_v3, %v1892_v9  ;;  %v1967_v8 = vsub.f32 %v4341_v5, %v1892_v9 }
 0x539   : > { %3291 = vpow2.f32 %v2035_v55  ;;  %v1968_v56 = vsub.f32 %v4350_v12, %v1892_v9 }
 0x53a   : > { %v4559_v58 = vpop.eup %3273  ;;  %3293 = vpow2.f32 %v2037_v63  ;;  %v2041_v2 = vmul.f32 1.442695, %v1965_v30  ;;  %v2043_v50 = vmul.f32 1.442695, %v1966_v15  ;;  %v2045_v18 = vmul.f32 1.442695, %v1967_v8 }
 0x53b   : > { %v4561_v45 = vpop.eup %3275  ;;  %3295 = vpow2.f32 %v2039_v31  ;;  %v2047_v25 = vmul.f32 1.442695, %v1968_v56  ;;  %v1897_v51 = vpop.xlane.xlu1 %1896 }
 0x53c   : > { %v4563_v36 = vpop.eup %3277  ;;  %3297 = vpow2.f32 %v2041_v2  ;;  %v1969_v61 = vsub.f32 %v4347_v7, %v1897_v51  ;;  %v1970_v3 = vsub.f32 %v4353_v57, %v1897_v51  ;;  %v1971_v5 = vsub.f32 %v4357_v14, %v1897_v51 }
 0x53d   : > { %v4568_v12 = vpop.eup %3279  ;;  %3299 = vpow2.f32 %v2043_v50  ;;  %v1972_v53 = vsub.f32 %v4366_v40, %v1897_v51  ;;  %v2145_v39 = vadd.f32 %v4561_v45, %v4559_v58 }
 0x53e   : > { %v4573_v27 = vpop.eup %3281  ;;  %3301 = vpow2.f32 %v2045_v18  ;;  %v2049_v62 = vmul.f32 1.442695, %v1969_v61  ;;  %v2051_v37 = vmul.f32 1.442695, %v1970_v3  ;;  %v2053_v54 = vmul.f32 1.442695, %v1971_v5 }
 0x53f   : > { %v4575_v35 = vpop.eup %3283  ;;  %3303 = vpow2.f32 %v2047_v25  ;;  %v2055_v7 = vmul.f32 1.442695, %v1972_v53  ;;  %v1902_v57 = vpop.xlane.xlu0 %1901  ;;  %v2146_v14 = vadd.f32 %v4563_v36, %v2145_v39 }
 0x540   : > { %v4578_v44 = vpop.eup %3285  ;;  %3305 = vpow2.f32 %v2049_v62  ;;  %v1973_v40 = vsub.f32 %v4363_v19, %v1902_v57  ;;  %v1974_v46 = vsub.f32 %v4369_v43, %v1902_v57  ;;  %v1975_v48 = vsub.f32 %v4373_v29, %v1902_v57 }
 0x541   : > { %v4583_v55 = vpop.eup %3287  ;;  %3307 = vpow2.f32 %v2051_v37  ;;  %v1976_v63 = vsub.f32 %v4382_v1, %v1902_v57  ;;  %v2147_v31 = vadd.f32 %v4568_v12, %v2146_v14  ;;  %v2150_v9 = vadd.f32 %v4575_v35, %v4573_v27 }
 0x542   : > { %v4589_v30 = vpop.eup %3289  ;;  %3309 = vpow2.f32 %v2053_v54  ;;  %v2057_v15 = vmul.f32 1.442695, %v1973_v40  ;;  %v2059_v8 = vmul.f32 1.442695, %v1974_v46  ;;  %v2061_v19 = vmul.f32 1.442695, %v1975_v48 }
 0x543   : > { %v4591_v56 = vpop.eup %3291  ;;  %3311 = vpow2.f32 %v2055_v7  ;;  %v2063_v43 = vmul.f32 1.442695, %v1976_v63  ;;  %2148 = vadd.xlane.f32.xlu1 %v2147_v31  ;;  %v1907_v29 = vpop.xlane.xlu1 %1906  ;;  %v2151_v2 = vadd.f32 %v4578_v44, %v2150_v9 }
 0x544   : > { %v4594_v1 = vpop.eup %3293  ;;  %3313 = vpow2.f32 %v2057_v15  ;;  %v1977_v50 = vsub.f32 %v4379_v42, %v1907_v29  ;;  %v1978_v18 = vsub.f32 %v4385_v47, %v1907_v29  ;;  %v1979_v25 = vsub.f32 %v4389_v26, %v1907_v29 }
 0x545   : > { %v4599_v51 = vpop.eup %3295  ;;  %3315 = vpow2.f32 %v2059_v8  ;;  %v1980_v61 = vsub.f32 %v4398_v59, %v1907_v29  ;;  %v2152_v3 = vadd.f32 %v4583_v55, %v2151_v2  ;;  %v2155_v5 = vadd.f32 %v4591_v56, %v4589_v30 }
 0x546   : > { %v4605_v53 = vpop.eup %3297  ;;  %3317 = vpow2.f32 %v2061_v19  ;;  %v2065_v39 = vmul.f32 1.442695, %v1977_v50  ;;  %v2067_v62 = vmul.f32 1.442695, %v1978_v18  ;;  %v2069_v42 = vmul.f32 1.442695, %v1979_v25 }
 0x547   : > { %v4607_v37 = vpop.eup %3299  ;;  %3319 = vpow2.f32 %v2063_v43  ;;  %v2071_v47 = vmul.f32 1.442695, %v1980_v61  ;;  %2153 = vadd.xlane.f32.xlu0 %v2152_v3  ;;  %v1912_v26 = vpop.xlane.xlu0 %1911  ;;  %v2156_v54 = vadd.f32 %v4594_v1, %v2155_v5 }
 0x548   : > { %v4610_v59 = vpop.eup %3301  ;;  %3321 = vpow2.f32 %v2065_v39  ;;  %v1981_v7 = vsub.f32 %v4395_v24, %v1912_v26  ;;  %v1982_v57 = vsub.f32 %v4401_v60, %v1912_v26  ;;  %v1983_v14 = vsub.f32 %v4405_v0, %v1912_v26 }
 0x549   : > { %v4615_v40 = vpop.eup %3303  ;;  %3323 = vpow2.f32 %v2067_v62  ;;  %v1984_v46 = vsub.f32 %v4414_v13, %v1912_v26  ;;  %v2157_v48 = vadd.f32 %v4599_v51, %v2156_v54  ;;  %v2160_v63 = vadd.f32 %v4607_v37, %v4605_v53 }
 0x54a   : > { %v4621_v31 = vpop.eup %3305  ;;  %3325 = vpow2.f32 %v2069_v42  ;;  %v2073_v9 = vmul.f32 1.442695, %v1981_v7  ;;  %v2075_v15 = vmul.f32 1.442695, %v1982_v57  ;;  %v2077_v24 = vmul.f32 1.442695, %v1983_v14 }
 0x54b   : > { %v4623_v8 = vpop.eup %3307  ;;  %3327 = vpow2.f32 %v2071_v47  ;;  %v2079_v60 = vmul.f32 1.442695, %v1984_v46  ;;  %2158 = vadd.xlane.f32.xlu1 %v2157_v48  ;;  %v1917_v0 = vpop.xlane.xlu1 %1916  ;;  %v2161_v19 = vadd.f32 %v4610_v59, %v2160_v63 }
 0x54c   : > { %v4626_v13 = vpop.eup %3309  ;;  %3329 = vpow2.f32 %v2073_v9  ;;  %v1985_v43 = vsub.f32 %v4411_v6, %v1917_v0  ;;  %v1986_v29 = vsub.f32 %v4417_v32, %v1917_v0  ;;  %v1987_v2 = vsub.f32 %v4421_v16, %v1917_v0 }
 0x54d   : > { %v4631_v50 = vpop.eup %3311  ;;  %3331 = vpow2.f32 %v2075_v15  ;;  %v1988_v18 = vsub.f32 %v4430_v41, %v1917_v0  ;;  %v2162_v25 = vadd.f32 %v4615_v40, %v2161_v19  ;;  %v2165_v61 = vadd.f32 %v4623_v8, %v4621_v31  ;;  %v5087_v19 = vld [vmem:[#allocation17_spill] sm:$0xff] }
 0x54e   : > { %v4637_v3 = vpop.eup %3313  ;;  %3333 = vpow2.f32 %v2077_v24  ;;  %v2081_v5 = vmul.f32 1.442695, %v1985_v43  ;;  %v2083_v39 = vmul.f32 1.442695, %v1986_v29  ;;  %v2085_v6 = vmul.f32 1.442695, %v1987_v2 }
 0x54f   : > { %v4639_v62 = vpop.eup %3315  ;;  %3335 = vpow2.f32 %v2079_v60  ;;  %v2087_v32 = vmul.f32 1.442695, %v1988_v18  ;;  %2163 = vadd.xlane.f32.xlu0 %v2162_v25  ;;  %v1922_v16 = vpop.xlane.xlu0 %1921  ;;  %v2166_v42 = vadd.f32 %v4626_v13, %v2165_v61  ;;  %v5088_v2 = vld [vmem:[#allocation19_spill] sm:$0xff] }
 0x550   : > { %v4642_v41 = vpop.eup %3317  ;;  %3337 = vpow2.f32 %v2081_v5  ;;  %v1989_v47 = vsub.f32 %v4427_v33, %v1922_v16  ;;  %v1990_v26 = vsub.f32 %v4433_v22, %v1922_v16  ;;  %v1991_v54 = vsub.f32 %v4437_v49, %v1922_v16 }
 0x551   : > { %v4647_v7 = vpop.eup %3319  ;;  %3339 = vpow2.f32 %v2083_v39  ;;  %v1992_v57 = vsub.f32 %v4446_v4, %v1922_v16  ;;  %v2167_v14 = vadd.f32 %v4631_v50, %v2166_v42  ;;  %v2170_v46 = vadd.f32 %v4639_v62, %v4637_v3 }
 0x552   : > { %v4653_v48 = vpop.eup %3321  ;;  %3341 = vpow2.f32 %v2085_v6  ;;  %v2089_v63 = vmul.f32 1.442695, %v1989_v47  ;;  %v2091_v9 = vmul.f32 1.442695, %v1990_v26  ;;  %v2093_v33 = vmul.f32 1.442695, %v1991_v54 }
 0x553   : > { %v4655_v15 = vpop.eup %3323  ;;  %3343 = vpow2.f32 %v2087_v32  ;;  %v2095_v22 = vmul.f32 1.442695, %v1992_v57  ;;  %2168 = vadd.xlane.f32.xlu1 %v2167_v14  ;;  %v1927_v49 = vpop.xlane.xlu1 %1926  ;;  %v2171_v24 = vadd.f32 %v4642_v41, %v2170_v46  ;;  %v5089_v26 = vld [vmem:[#allocation18_spill] sm:$0xff]  ;;  %v5090_v57 = vld [vmem:[#allocation20_spill] sm:$0xff]  ;;  %v5091_v46 = vld [vmem:[#allocation21_spill] sm:$0xff] }
 0x554   : > { %v4658_v4 = vpop.eup %3325  ;;  %3345 = vpow2.f32 %v2089_v63  ;;  %v1993_v60 = vsub.f32 %v4443_v20, %v1927_v49  ;;  %v1994_v0 = vsub.f32 %v4449_v34, %v1927_v49  ;;  %v1995_v43 = vsub.f32 %v5087_v19, %v1927_v49 }
 0x555   : > { %v4663_v29 = vpop.eup %3327  ;;  %3347 = vpow2.f32 %v2091_v9  ;;  %v1996_v18 = vsub.f32 %v5088_v2, %v1927_v49  ;;  %v2172_v25 = vadd.f32 %v4647_v7, %v2171_v24  ;;  %v2175_v61 = vadd.f32 %v4655_v15, %v4653_v48 }
 0x556   : > { %v4669_v5 = vpop.eup %3329  ;;  %3349 = vpow2.f32 %v2093_v33  ;;  %v2097_v39 = vmul.f32 1.442695, %v1993_v60  ;;  %v2099_v6 = vmul.f32 1.442695, %v1994_v0  ;;  %v2101_v20 = vmul.f32 1.442695, %v1995_v43 }
 0x557   : > { %v4671_v32 = vpop.eup %3331  ;;  %3351 = vpow2.f32 %v2095_v22  ;;  %v2103_v34 = vmul.f32 1.442695, %v1996_v18  ;;  %2173 = vadd.xlane.f32.xlu0 %v2172_v25  ;;  %v1932_v16 = vpop.xlane.xlu0 %1931  ;;  %v2176_v42 = vadd.f32 %v4658_v4, %v2175_v61  ;;  %v5092_v33 = vld [vmem:[#allocation23_spill] sm:$0xff] }
 0x558   : > { %v4674_v47 = vpop.eup %3333  ;;  %3353 = vpow2.f32 %v2097_v39  ;;  %v1997_v54 = vsub.f32 %v5089_v26, %v1932_v16  ;;  %v1998_v14 = vsub.f32 %v5090_v57, %v1932_v16  ;;  %v1999_v63 = vsub.f32 %v5091_v46, %v1932_v16  ;;  %v5096_v57 = vld [vmem:[#allocation25_spill] sm:$0xff] }
 0x559   : > { %v4679_v9 = vpop.eup %3335  ;;  %3355 = vpow2.f32 %v2099_v6  ;;  %v2000_v49 = vsub.f32 %v5092_v33, %v1932_v16  ;;  %v2177_v22 = vadd.f32 %v4663_v29, %v2176_v42  ;;  %v2180_v24 = vadd.f32 %v4671_v32, %v4669_v5  ;;  %v5094_v6 = vld [vmem:[#allocation22_spill] sm:$0xff]  ;;  %v5095_v42 = vld [vmem:[#allocation24_spill] sm:$0xff] }
 0x55a   : > { %v4685_v60 = vpop.eup %3337  ;;  %3357 = vpow2.f32 %v2101_v20  ;;  %v2105_v0 = vmul.f32 1.442695, %v1997_v54  ;;  %v2107_v19 = vmul.f32 1.442695, %v1998_v14  ;;  %v2109_v43 = vmul.f32 1.442695, %v1999_v63 }
 0x55b   : > { %v4687_v2 = vpop.eup %3339  ;;  %3359 = vpow2.f32 %v2103_v34  ;;  %v2111_v18 = vmul.f32 1.442695, %v2000_v49  ;;  %2178 = vadd.xlane.f32.xlu1 %v2177_v22  ;;  %v1937_v25 = vpop.xlane.xlu1 %1936  ;;  %v2181_v61 = vadd.f32 %v4674_v47, %v2180_v24  ;;  %v5097_v14 = vld [vmem:[#allocation27_spill] sm:$0xff] }
 0x55c   : > { %5093 = vst [vmem:[#allocation17_spill] sm:$0xff] %v4687_v2  ;;  %v4690_v39 = vpop.eup %3341  ;;  %3361 = vpow2.f32 %v2105_v0  ;;  %v2001_v16 = vsub.f32 %v5094_v6, %v1937_v25  ;;  %v2002_v26 = vsub.f32 %v5095_v42, %v1937_v25  ;;  %v2003_v20 = vsub.f32 %v5096_v57, %v1937_v25 }
 0x55d   : > { %v4695_v54 = vpop.eup %3343  ;;  %3363 = vpow2.f32 %v2107_v19  ;;  %v2004_v46 = vsub.f32 %v5097_v14, %v1937_v25  ;;  %v2182_v34 = vadd.f32 %v4679_v9, %v2181_v61  ;;  %v2185_v63 = vadd.f32 %v4687_v2, %v4685_v60  ;;  %v5098_v61 = vld [vmem:[#allocation26_spill] sm:$0xff]  ;;  %v5099_v14 = vld [vmem:[#allocation28_spill] sm:$0xff] }
 0x55e   : > { %v4701_v33 = vpop.eup %3345  ;;  %3365 = vpow2.f32 %v2109_v43  ;;  %v2113_v49 = vmul.f32 1.442695, %v2001_v16  ;;  %v2115_v22 = vmul.f32 1.442695, %v2002_v26  ;;  %v2117_v24 = vmul.f32 1.442695, %v2003_v20 }
 0x55f   : > { %v4703_v0 = vpop.eup %3347  ;;  %3367 = vpow2.f32 %v2111_v18  ;;  %v2119_v6 = vmul.f32 1.442695, %v2004_v46  ;;  %2183 = vadd.xlane.f32.xlu0 %v2182_v34  ;;  %v1942_v42 = vpop.xlane.xlu0 %1941  ;;  %v2186_v19 = vadd.f32 %v4690_v39, %v2185_v63 }
 0x560   : > { %v4706_v25 = vpop.eup %3349  ;;  %3369 = vpow2.f32 %v2113_v49  ;;  %v2005_v57 = vsub.f32 %v5098_v61, %v1942_v42  ;;  %v2006_v2 = vsub.f32 %v5099_v14, %v1942_v42  ;;  %v2007_v43 = vsub.f32 %v4501_v17, %v1942_v42 }
 0x561   : > { %v4711_v16 = vpop.eup %3351  ;;  %3371 = vpow2.f32 %v2115_v22  ;;  %v2008_v26 = vsub.f32 %v4510_v28, %v1942_v42  ;;  %v2187_v18 = vadd.f32 %v4695_v54, %v2186_v19  ;;  %v2190_v20 = vadd.f32 %v4703_v0, %v4701_v33 }
 0x562   : > { %v4717_v46 = vpop.eup %3353  ;;  %3373 = vpow2.f32 %v2117_v24  ;;  %v2121_v34 = vmul.f32 1.442695, %v2005_v57  ;;  %v2123_v63 = vmul.f32 1.442695, %v2006_v2  ;;  %v2125_v49 = vmul.f32 1.442695, %v2007_v43 }
 0x563   : > { %5100 = vst [vmem:[#allocation19_spill] sm:$0xff] %v4717_v46  ;;  %v4719_v61 = vpop.eup %3355  ;;  %3375 = vpow2.f32 %v2119_v6  ;;  %v2127_v17 = vmul.f32 1.442695, %v2008_v26  ;;  %2188 = vadd.xlane.f32.xlu1 %v2187_v18  ;;  %v1947_v14 = vpop.xlane.xlu1 %1946  ;;  %v2191_v22 = vadd.f32 %v4706_v25, %v2190_v20 }
 0x564   : > { %5101 = vst [vmem:[#allocation18_spill] sm:$0xff] %v4719_v61  ;;  %v4722_v28 = vpop.eup %3357  ;;  %3377 = vpow2.f32 %v2121_v34  ;;  %v2009_v42 = vsub.f32 %v4507_v23, %v1947_v14  ;;  %v2010_v19 = vsub.f32 %v4513_v21, %v1947_v14  ;;  %v2011_v24 = vsub.f32 %v4517_v11, %v1947_v14 }
 0x565   : > { %v4727_v57 = vpop.eup %3359  ;;  %3379 = vpow2.f32 %v2123_v63  ;;  %v2012_v2 = vsub.f32 %v4526_v10, %v1947_v14  ;;  %v2192_v6 = vadd.f32 %v4711_v16, %v2191_v22  ;;  %v2195_v43 = vadd.f32 %v4719_v61, %v4717_v46  ;;  %v5102_v14 = vld [vmem:[#allocation29_spill] sm:$0xff]  ;;  %v5103_v61 = vld [vmem:[#allocation30_spill] sm:$0xff] }
 0x566   : > { %v4733_v26 = vpop.eup %3361  ;;  %3381 = vpow2.f32 %v2125_v49  ;;  %v2129_v18 = vmul.f32 1.442695, %v2009_v42  ;;  %v2131_v20 = vmul.f32 1.442695, %v2010_v19  ;;  %v2133_v23 = vmul.f32 1.442695, %v2011_v24 }
 0x567   : > { %v4735_v34 = vpop.eup %3363  ;;  %3383 = vpow2.f32 %v2127_v17  ;;  %v2135_v21 = vmul.f32 1.442695, %v2012_v2  ;;  %2193 = vadd.xlane.f32.xlu0 %v2192_v6  ;;  %v1952_v11 = vpop.xlane.xlu0 %1951  ;;  %v2196_v63 = vadd.f32 %v4722_v28, %v2195_v43 }
 0x568   : > { %v4738_v10 = vpop.eup %3365  ;;  %3385 = vpow2.f32 %v2129_v18  ;;  %v2013_v22 = vsub.f32 %v5102_v14, %v1952_v11  ;;  %v2014_v46 = vsub.f32 %v5103_v61, %v1952_v11  ;;  %v2015_v49 = vsub.f32 %v4533_v38, %v1952_v11 }
 0x569   : > { %v4743_v42 = vpop.eup %3367  ;;  %3387 = vpow2.f32 %v2131_v20  ;;  %v2016_v19 = vsub.f32 %v4539_v52, %v1952_v11  ;;  %v2197_v17 = vadd.f32 %v4727_v57, %v2196_v63  ;;  %v2200_v24 = vadd.f32 %v4735_v34, %v4733_v26 }
 0x56a   : > { %v4749_v2 = vpop.eup %3369  ;;  %3389 = vpow2.f32 %v2133_v23  ;;  %v2137_v6 = vmul.f32 1.442695, %v2013_v22  ;;  %v2139_v43 = vmul.f32 1.442695, %v2014_v46  ;;  %v2141_v61 = vmul.f32 1.442695, %v2015_v49 }
 0x56b   : > { %v4751_v18 = vpop.eup %3371  ;;  %3391 = vpow2.f32 %v2135_v21  ;;  %2198 = vadd.xlane.f32.xlu1 %v2197_v17  ;;  %v2201_v38 = vadd.f32 %v4738_v10, %v2200_v24  ;;  %v2143_v63 = vmul.f32 1.442695, %v2016_v19 }
 0x56c   : > { %v4754_v20 = vpop.eup %3373  ;;  %3393 = vpow2.f32 %v2137_v6  ;;  %v2205_v52 = vadd.f32 %v4751_v18, %v4749_v2 }
 0x56d   : > { %v4758_v11 = vpop.eup %3375  ;;  %3395 = vpow2.f32 %v2139_v43  ;;  %v2202_v23 = vadd.f32 %v4743_v42, %v2201_v38 }
 0x56e   : > { %v4761_v46 = vpop.eup %3377  ;;  %v2206_v21 = vadd.f32 %v4754_v20, %v2205_v52  ;;  %3397 = vpow2.f32 %v2141_v61 }
 0x56f   : > { %v4764_v14 = vpop.eup %3379  ;;  %2203 = vadd.xlane.f32.xlu0 %v2202_v23  ;;  %3399 = vpow2.f32 %v2143_v63 }
 0x570   : > { %v4766_v22 = vpop.eup %3381  ;;  %v2207_v49 = vadd.f32 %v4758_v11, %v2206_v21  ;;  %v2210_v17 = vadd.f32 %v4764_v14, %v4761_v46 }
 0x571   : > { %5104 = vst [vmem:[#allocation20_spill] sm:$0xff] %v4766_v22  ;;  %v4771_v24 = vpop.eup %3383 }
 0x572   : > { %5105 = vst [vmem:[#allocation21_spill] sm:$0xff] %v4771_v24  ;;  %v4773_v19 = vpop.eup %3385  ;;  %2208 = vadd.xlane.f32.xlu1 %v2207_v49  ;;  %v2211_v6 = vadd.f32 %v4766_v22, %v2210_v17 }
 0x573   : > { %5106 = vst [vmem:[#allocation23_spill] sm:$0xff] %v4773_v19  ;;  %v4776_v43 = vpop.eup %3387 }
 0x574   : > { %5107 = vst [vmem:[#allocation22_spill] sm:$0xff] %v4776_v43  ;;  %v4778_v38 = vpop.eup %3389  ;;  %v2212_v61 = vadd.f32 %v4771_v24, %v2211_v6  ;;  %v2215_v52 = vadd.f32 %v4776_v43, %v4773_v19 }
 0x575   : > { %v4783_v23 = vpop.eup %3391 }
 0x576   : > { %v4785_v21 = vpop.eup %3393  ;;  %2213 = vadd.xlane.f32.xlu0 %v2212_v61  ;;  %v2216_v63 = vadd.f32 %v4778_v38, %v2215_v52 }
 0x577   : > { %v4788_v49 = vpop.eup %3395 }
 0x578   : > { %v2217_v17 = vadd.f32 %v4783_v23, %v2216_v63  ;;  %v2220_v6 = vadd.f32 %v4788_v49, %v4785_v21  ;;  %v4793_v24 = vpop.eup %3397 }
 0x579   : > { %5108 = vst [vmem:[#allocation24_spill] sm:$0xff] %v4793_v24  ;;  %v4796_v19 = vpop.eup %3399 }
 0x57a   : > { %2218 = vadd.xlane.f32.xlu1 %v2217_v17  ;;  %v2221_v43 = vadd.f32 %v4793_v24, %v2220_v6  ;;  %5109 = vst [vmem:[#allocation25_spill] sm:$0xff] %v4796_v19 }
 0x57c   : > { %v2222_v22 = vadd.f32 %v4796_v19, %v2221_v43 }
 0x57e   : > { %2223 = vadd.xlane.f32.xlu0 %v2222_v22 }
 0x57f   : > { %3532 = shalt.err (!%p3529_p13)
}
 0x580   : > { %s3533_s23 = scalar_lea.hbm %s4804_s30, 2048  ;;  %s3537_s14 = scalar_lea.hbm %s5026_s11, 4096 }
 0x581   : > { %p3534_p6 = scmp.ne.s32.totalorder %s4804_s30, %s3533_s23  ;;  %p3538_p7 = scmp.lt.u32.totalorder %s4804_s30, %s5026_s11 }
 0x582   : > { %p3539_p8 = scmp.lt.u32.totalorder %s3537_s14, %s3533_s23  ;;  %p3541_p0 = scmp.lt.u32.totalorder %s3533_s23, %s4804_s30 }
 0x583   : > { %p3535_p10 = pnand %p3534_p6, %p5110_p1 }
 0x584   : > { %p3540_p11 = por %p3539_p8, %p3538_p7 }
 0x585   : > { %p3536_p4 = pneg %p3535_p10 }
 0x586   : > { %p3542_p3 = por %p3541_p0, %p3540_p11 }
 0x588   : > { %p3543_p5 = pnand %p3542_p3, %p3536_p4 }
 0x58a   : > { %3546 = shalt.err (!%p3543_p5)
}
 0x58b   : > { %s3633_s17 = smov 128   ;;  %s3634_s25 = smov 8  }
 0x58c   : > { %3106 = dma.vmem_to_hbm [thread:$0]  (%p5110_p1), %s4806_s10, 2048, %s4804_s30, %s2391_s27, %s3633_s17, %s3633_s17, %s3634_s25  }
 0x58d   : > { %s4838_s23 = scalar_lea.vmem [#allocation8], %s2567_s22  ;;  %s2605_s22 = sshll.u32 %s3719_s21, 13 }
 0x58e   : > { %s2405_s10 = sshll.u32 %s4838_s23, 4  ;;  %s5118_s15 = sld [smem:[#allocation31_spill]]  ;;  %s4963_s10 = int_to_ptr.vmem [resolvable:$true] %s2405_s10 }
 0x58f   : > { %s2386_s21 = scalar_lea.sflag [#allocation4], %s3876_s12  ;;  %s3547_s14 = scalar_lea.vmem %s4963_s10, 8192 }
 0x590   : > { %p3548_p9 = scmp.ne.s32.totalorder %s4963_s10, %s3547_s14  ;;  %s3635_s29 = smov [#allocation8]  }
 0x591   : > { %s3551_s26 = sshll.u32 %s3635_s29, 4  ;;  %s3552_s26 = int_to_ptr.vmem [resolvable:$false] %s3551_s26 }
 0x592   : > { %p3549_p12 = pnand %p3548_p9, %p5110_p1  ;;  %s3553_s17 = scalar_lea.vmem %s3552_s26, 16384 }
 0x593   : > { %p3554_p13 = scmp.lt.s32.totalorder %s4963_s10, %s3552_s26  ;;  %p3555_p6 = scmp.lt.s32.totalorder %s3553_s17, %s3547_s14 }
 0x594   : > { %s4961_s24 = scalar_lea.hbm %s5118_s15, %s2605_s22  ;;  %p3550_p2 = pneg %p3549_p12 }
 0x595   : > { %p3556_p10 = por %p3555_p6, %p3554_p13 }
 0x597   : > { %p3557_p4 = pnand %p3556_p10, %p3550_p2 }
 0x5d0   : > { %v2149_v22 = vpop.xlane.xlu1 %2148 }
 0x5d1   : > { %3401 = vrcp.f32 %v2149_v22 }
 0x5d4   : > { %v2154_v43 = vpop.xlane.xlu0 %2153 }
 0x5d5   : > { %3403 = vrcp.f32 %v2154_v43 }
 0x5d8   : > { %v2159_v61 = vpop.xlane.xlu1 %2158 }
 0x5d9   : > { %3405 = vrcp.f32 %v2159_v61 }
 0x5db   : > { %v3402_v52 = vpop.eup %3401 }
 0x5dc   : > { %v2241_v63 = vmul.f32 %v3402_v52, %v4559_v58  ;;  %v2242_v17 = vmul.f32 %v3402_v52, %v4561_v45  ;;  %v2243_v6 = vmul.f32 %v3402_v52, %v4563_v36  ;;  %v2244_v19 = vmul.f32 %v3402_v52, %v4568_v12  ;;  %v2164_v24 = vpop.xlane.xlu0 %2163 }
 0x5dd   : > { %3407 = vrcp.f32 %v2164_v24 }
 0x5de   : > { %2305 = vst [vmem:[%s4838_s23] sm:$0xff] %v2241_v63  ;;  %2306 = vst [vmem:[%s4838_s23 + $0x8] sm:$0xff] %v2242_v17 }
 0x5df   : > { %2307 = vst [vmem:[%s4838_s23 + $0x10] sm:$0xff] %v2243_v6  ;;  %2308 = vst [vmem:[%s4838_s23 + $0x18] sm:$0xff] %v2244_v19  ;;  %v3404_v58 = vpop.eup %3403 }
 0x5e0   : > { %v2245_v45 = vmul.f32 %v3404_v58, %v4573_v27  ;;  %v2246_v36 = vmul.f32 %v3404_v58, %v4575_v35  ;;  %v2247_v12 = vmul.f32 %v3404_v58, %v4578_v44  ;;  %v2248_v24 = vmul.f32 %v3404_v58, %v4583_v55  ;;  %v2169_v22 = vpop.xlane.xlu1 %2168 }
 0x5e1   : > { %3409 = vrcp.f32 %v2169_v22 }
 0x5e2   : > { %2309 = vst [vmem:[%s4838_s23 + $0x20] sm:$0xff] %v2245_v45  ;;  %2310 = vst [vmem:[%s4838_s23 + $0x28] sm:$0xff] %v2246_v36 }
 0x5e3   : > { %2311 = vst [vmem:[%s4838_s23 + $0x30] sm:$0xff] %v2247_v12  ;;  %2312 = vst [vmem:[%s4838_s23 + $0x38] sm:$0xff] %v2248_v24  ;;  %v3406_v19 = vpop.eup %3405 }
 0x5e4   : > { %v2249_v43 = vmul.f32 %v3406_v19, %v4589_v30  ;;  %v2250_v27 = vmul.f32 %v3406_v19, %v4591_v56  ;;  %v2251_v35 = vmul.f32 %v3406_v19, %v4594_v1  ;;  %v2252_v44 = vmul.f32 %v3406_v19, %v4599_v51  ;;  %v2174_v55 = vpop.xlane.xlu0 %2173 }
 0x5e5   : > { %3411 = vrcp.f32 %v2174_v55 }
 0x5e6   : > { %2313 = vst [vmem:[%s4838_s23 + $0x40] sm:$0xff] %v2249_v43  ;;  %2314 = vst [vmem:[%s4838_s23 + $0x48] sm:$0xff] %v2250_v27 }
 0x5e7   : > { %2315 = vst [vmem:[%s4838_s23 + $0x50] sm:$0xff] %v2251_v35  ;;  %2316 = vst [vmem:[%s4838_s23 + $0x58] sm:$0xff] %v2252_v44  ;;  %v3408_v61 = vpop.eup %3407 }
 0x5e8   : > { %v2253_v52 = vmul.f32 %v3408_v61, %v4605_v53  ;;  %v2254_v30 = vmul.f32 %v3408_v61, %v4607_v37  ;;  %v2255_v56 = vmul.f32 %v3408_v61, %v4610_v59  ;;  %v2256_v1 = vmul.f32 %v3408_v61, %v4615_v40  ;;  %v2179_v51 = vpop.xlane.xlu1 %2178 }
 0x5e9   : > { %3413 = vrcp.f32 %v2179_v51 }
 0x5ea   : > { %2317 = vst [vmem:[%s4838_s23 + $0x60] sm:$0xff] %v2253_v52  ;;  %2318 = vst [vmem:[%s4838_s23 + $0x68] sm:$0xff] %v2254_v30  ;;  %v5112_v52 = vld [vmem:[#allocation19_spill] sm:$0xff] }
 0x5eb   : > { %2319 = vst [vmem:[%s4838_s23 + $0x70] sm:$0xff] %v2255_v56  ;;  %2320 = vst [vmem:[%s4838_s23 + $0x78] sm:$0xff] %v2256_v1  ;;  %v3410_v63 = vpop.eup %3409 }
 0x5ec   : > { %v2257_v17 = vmul.f32 %v3410_v63, %v4621_v31  ;;  %v2258_v53 = vmul.f32 %v3410_v63, %v4623_v8  ;;  %v2259_v37 = vmul.f32 %v3410_v63, %v4626_v13  ;;  %v2260_v59 = vmul.f32 %v3410_v63, %v4631_v50  ;;  %v2184_v40 = vpop.xlane.xlu0 %2183 }
 0x5ed   : > { %3415 = vrcp.f32 %v2184_v40 }
 0x5ee   : > { %2321 = vst [vmem:[%s4838_s23 + $0x80] sm:$0xff] %v2257_v17  ;;  %2322 = vst [vmem:[%s4838_s23 + $0x88] sm:$0xff] %v2258_v53 }
 0x5ef   : > { %2323 = vst [vmem:[%s4838_s23 + $0x90] sm:$0xff] %v2259_v37  ;;  %2324 = vst [vmem:[%s4838_s23 + $0x98] sm:$0xff] %v2260_v59  ;;  %v3412_v6 = vpop.eup %3411 }
 0x5f0   : > { %v2261_v58 = vmul.f32 %v3412_v6, %v4637_v3  ;;  %v2262_v31 = vmul.f32 %v3412_v6, %v4639_v62  ;;  %v2263_v8 = vmul.f32 %v3412_v6, %v4642_v41  ;;  %v2264_v13 = vmul.f32 %v3412_v6, %v4647_v7  ;;  %v2189_v50 = vpop.xlane.xlu1 %2188 }
 0x5f1   : > { %3417 = vrcp.f32 %v2189_v50 }
 0x5f2   : > { %2325 = vst [vmem:[%s4838_s23 + $0xa0] sm:$0xff] %v2261_v58  ;;  %2326 = vst [vmem:[%s4838_s23 + $0xa8] sm:$0xff] %v2262_v31  ;;  %v5116_v58 = vld [vmem:[#allocation23_spill] sm:$0xff] }
 0x5f3   : > { %2327 = vst [vmem:[%s4838_s23 + $0xb0] sm:$0xff] %v2263_v8  ;;  %2328 = vst [vmem:[%s4838_s23 + $0xb8] sm:$0xff] %v2264_v13  ;;  %v3414_v45 = vpop.eup %3413  ;;  %v5117_v8 = vld [vmem:[#allocation22_spill] sm:$0xff] }
 0x5f4   : > { %v2265_v36 = vmul.f32 %v3414_v45, %v4653_v48  ;;  %v2266_v3 = vmul.f32 %v3414_v45, %v4655_v15  ;;  %v2267_v62 = vmul.f32 %v3414_v45, %v4658_v4  ;;  %v2268_v41 = vmul.f32 %v3414_v45, %v4663_v29  ;;  %v2194_v7 = vpop.xlane.xlu0 %2193  ;;  %v5119_v45 = vld [vmem:[#allocation24_spill] sm:$0xff] }
 0x5f5   : > { %3419 = vrcp.f32 %v2194_v7 }
 0x5f6   : > { %2329 = vst [vmem:[%s4838_s23 + $0xc0] sm:$0xff] %v2265_v36  ;;  %2330 = vst [vmem:[%s4838_s23 + $0xc8] sm:$0xff] %v2266_v3  ;;  %v5120_v3 = vld [vmem:[#allocation25_spill] sm:$0xff] }
 0x5f7   : > { %2331 = vst [vmem:[%s4838_s23 + $0xd0] sm:$0xff] %v2267_v62  ;;  %2332 = vst [vmem:[%s4838_s23 + $0xd8] sm:$0xff] %v2268_v41  ;;  %v3416_v12 = vpop.eup %3415 }
 0x5f8   : > { %v2269_v24 = vmul.f32 %v3416_v12, %v4669_v5  ;;  %v2270_v48 = vmul.f32 %v3416_v12, %v4671_v32  ;;  %v2271_v15 = vmul.f32 %v3416_v12, %v4674_v47  ;;  %v2272_v4 = vmul.f32 %v3416_v12, %v4679_v9  ;;  %v2199_v29 = vpop.xlane.xlu1 %2198  ;;  %v5111_v5 = vld [vmem:[#allocation17_spill] sm:$0xff] }
 0x5f9   : > { %3421 = vrcp.f32 %v2199_v29 }
 0x5fa   : > { %2333 = vst [vmem:[%s4838_s23 + $0xe0] sm:$0xff] %v2269_v24  ;;  %2334 = vst [vmem:[%s4838_s23 + $0xe8] sm:$0xff] %v2270_v48 }
 0x5fb   : > { %2335 = vst [vmem:[%s4838_s23 + $0xf0] sm:$0xff] %v2271_v15  ;;  %2336 = vst [vmem:[%s4838_s23 + $0xf8] sm:$0xff] %v2272_v4  ;;  %v3418_v22 = vpop.eup %3417 }
 0x5fc   : > { %v2273_v19 = vmul.f32 %v3418_v22, %v4685_v60  ;;  %v2274_v43 = vmul.f32 %v3418_v22, %v5111_v5  ;;  %v2275_v32 = vmul.f32 %v3418_v22, %v4690_v39  ;;  %v2276_v47 = vmul.f32 %v3418_v22, %v4695_v54  ;;  %v2204_v9 = vpop.xlane.xlu0 %2203 }
 0x5fd   : > { %3423 = vrcp.f32 %v2204_v9 }
 0x5fe   : > { %2337 = vst [vmem:[%s4838_s23 + $0x100] sm:$0xff] %v2273_v19  ;;  %2338 = vst [vmem:[%s4838_s23 + $0x108] sm:$0xff] %v2274_v43 }
 0x5ff   : > { %2339 = vst [vmem:[%s4838_s23 + $0x110] sm:$0xff] %v2275_v32  ;;  %2340 = vst [vmem:[%s4838_s23 + $0x118] sm:$0xff] %v2276_v47  ;;  %v3420_v27 = vpop.eup %3419  ;;  %v2209_v35 = vpop.xlane.xlu1 %2208 }
 0x600   : > { %v2277_v60 = vmul.f32 %v3420_v27, %v4701_v33  ;;  %v2278_v44 = vmul.f32 %v3420_v27, %v4703_v0  ;;  %v2279_v39 = vmul.f32 %v3420_v27, %v4706_v25  ;;  %v2280_v54 = vmul.f32 %v3420_v27, %v4711_v16  ;;  %v5113_v33 = vld [vmem:[#allocation18_spill] sm:$0xff] }
 0x601   : > { %3425 = vrcp.f32 %v2209_v35 }
 0x602   : > { %2341 = vst [vmem:[%s4838_s23 + $0x120] sm:$0xff] %v2277_v60  ;;  %2342 = vst [vmem:[%s4838_s23 + $0x128] sm:$0xff] %v2278_v44 }
 0x603   : > { %2343 = vst [vmem:[%s4838_s23 + $0x130] sm:$0xff] %v2279_v39  ;;  %2344 = vst [vmem:[%s4838_s23 + $0x138] sm:$0xff] %v2280_v54  ;;  %v3422_v55 = vpop.eup %3421  ;;  %v2214_v61 = vpop.xlane.xlu0 %2213 }
 0x604   : > { %v2281_v30 = vmul.f32 %v3422_v55, %v5112_v52  ;;  %v2282_v56 = vmul.f32 %v3422_v55, %v5113_v33  ;;  %v2283_v0 = vmul.f32 %v3422_v55, %v4722_v28  ;;  %v2284_v25 = vmul.f32 %v3422_v55, %v4727_v57 }
 0x605   : > { %3427 = vrcp.f32 %v2214_v61 }
 0x606   : > { %2345 = vst [vmem:[%s4838_s23 + $0x140] sm:$0xff] %v2281_v30  ;;  %2346 = vst [vmem:[%s4838_s23 + $0x148] sm:$0xff] %v2282_v56 }
 0x607   : > { %2347 = vst [vmem:[%s4838_s23 + $0x150] sm:$0xff] %v2283_v0  ;;  %2348 = vst [vmem:[%s4838_s23 + $0x158] sm:$0xff] %v2284_v25  ;;  %v3424_v16 = vpop.eup %3423  ;;  %v2219_v1 = vpop.xlane.xlu1 %2218 }
 0x608   : > { %v2285_v51 = vmul.f32 %v3424_v16, %v4733_v26  ;;  %v2286_v63 = vmul.f32 %v3424_v16, %v4735_v34  ;;  %v2287_v17 = vmul.f32 %v3424_v16, %v4738_v10  ;;  %v2288_v28 = vmul.f32 %v3424_v16, %v4743_v42 }
 0x609   : > { %3429 = vrcp.f32 %v2219_v1 }
 0x60a   : > { %2349 = vst [vmem:[%s4838_s23 + $0x160] sm:$0xff] %v2285_v51  ;;  %2350 = vst [vmem:[%s4838_s23 + $0x168] sm:$0xff] %v2286_v63 }
 0x60b   : > { %2351 = vst [vmem:[%s4838_s23 + $0x170] sm:$0xff] %v2287_v17  ;;  %2352 = vst [vmem:[%s4838_s23 + $0x178] sm:$0xff] %v2288_v28  ;;  %v3426_v57 = vpop.eup %3425  ;;  %v2224_v53 = vpop.xlane.xlu0 %2223 }
 0x60c   : > { %v2289_v26 = vmul.f32 %v3426_v57, %v4749_v2  ;;  %v2290_v34 = vmul.f32 %v3426_v57, %v4751_v18  ;;  %v2291_v10 = vmul.f32 %v3426_v57, %v4754_v20  ;;  %v2292_v42 = vmul.f32 %v3426_v57, %v4758_v11  ;;  %v5114_v18 = vld [vmem:[#allocation20_spill] sm:$0xff]  ;;  %v5115_v20 = vld [vmem:[#allocation21_spill] sm:$0xff] }
 0x60d   : > { %3431 = vrcp.f32 %v2224_v53 }
 0x60e   : > { %2353 = vst [vmem:[%s4838_s23 + $0x180] sm:$0xff] %v2289_v26  ;;  %2354 = vst [vmem:[%s4838_s23 + $0x188] sm:$0xff] %v2290_v34 }
 0x60f   : > { %2355 = vst [vmem:[%s4838_s23 + $0x190] sm:$0xff] %v2291_v10  ;;  %2356 = vst [vmem:[%s4838_s23 + $0x198] sm:$0xff] %v2292_v42  ;;  %v3428_v37 = vpop.eup %3427 }
 0x610   : > { %v2293_v59 = vmul.f32 %v3428_v37, %v4761_v46  ;;  %v2294_v2 = vmul.f32 %v3428_v37, %v4764_v14  ;;  %v2295_v40 = vmul.f32 %v3428_v37, %v5114_v18  ;;  %v2296_v11 = vmul.f32 %v3428_v37, %v5115_v20 }
 0x612   : > { %2357 = vst [vmem:[%s4838_s23 + $0x1a0] sm:$0xff] %v2293_v59  ;;  %2358 = vst [vmem:[%s4838_s23 + $0x1a8] sm:$0xff] %v2294_v2 }
 0x613   : > { %2359 = vst [vmem:[%s4838_s23 + $0x1b0] sm:$0xff] %v2295_v40  ;;  %2360 = vst [vmem:[%s4838_s23 + $0x1b8] sm:$0xff] %v2296_v11  ;;  %v3430_v6 = vpop.eup %3429 }
 0x614   : > { %v2297_v31 = vmul.f32 %v3430_v6, %v5116_v58  ;;  %v2298_v13 = vmul.f32 %v3430_v6, %v5117_v8  ;;  %v2299_v46 = vmul.f32 %v3430_v6, %v4778_v38  ;;  %v2300_v14 = vmul.f32 %v3430_v6, %v4783_v23 }
 0x616   : > { %2361 = vst [vmem:[%s4838_s23 + $0x1c0] sm:$0xff] %v2297_v31  ;;  %2362 = vst [vmem:[%s4838_s23 + $0x1c8] sm:$0xff] %v2298_v13 }
 0x617   : > { %2363 = vst [vmem:[%s4838_s23 + $0x1d0] sm:$0xff] %v2299_v46  ;;  %2364 = vst [vmem:[%s4838_s23 + $0x1d8] sm:$0xff] %v2300_v14  ;;  %v3432_v50 = vpop.eup %3431 }
 0x618   : > { %v2301_v38 = vmul.f32 %v3432_v50, %v4785_v21  ;;  %v2302_v23 = vmul.f32 %v3432_v50, %v4788_v49  ;;  %v2303_v36 = vmul.f32 %v3432_v50, %v5119_v45  ;;  %v2304_v62 = vmul.f32 %v3432_v50, %v5120_v3 }
 0x61a   : > { %2365 = vst [vmem:[%s4838_s23 + $0x1e0] sm:$0xff] %v2301_v38  ;;  %2366 = vst [vmem:[%s4838_s23 + $0x1e8] sm:$0xff] %v2302_v23 }
 0x61b   : > { %2367 = vst [vmem:[%s4838_s23 + $0x1f0] sm:$0xff] %v2303_v36  ;;  %2368 = vst [vmem:[%s4838_s23 + $0x1f8] sm:$0xff] %v2304_v62 }
 0x61c   : > { %3560 = shalt.err (!%p3557_p4)
}
 0x61d   : > { %s3561_s25 = scalar_lea.hbm %s4961_s24, 8192  ;;  %s3565_s30 = scalar_lea.hbm %s5118_s15, 16384 }
 0x61e   : > { %p3562_p7 = scmp.ne.s32.totalorder %s4961_s24, %s3561_s25  ;;  %p3566_p0 = scmp.lt.u32.totalorder %s4961_s24, %s5118_s15 }
 0x61f   : > { %p3567_p3 = scmp.lt.u32.totalorder %s3565_s30, %s3561_s25  ;;  %p3569_p9 = scmp.lt.u32.totalorder %s3561_s25, %s4961_s24 }
 0x620   : > { %p3563_p8 = pnand %p3562_p7, %p5110_p1 }
 0x621   : > { %p3568_p5 = por %p3567_p3, %p3566_p0 }
 0x622   : > { %p3564_p11 = pneg %p3563_p8 }
 0x623   : > { %p3570_p12 = por %p3569_p9, %p3568_p5 }
 0x625   : > { %p3571_p2 = pnand %p3570_p12, %p3564_p11 }
 0x627   : > { %3574 = shalt.err (!%p3571_p2)
}
 0x628   : > { %s3636_s14 = smov 512   ;;  %s3637_s26 = smov 32  }
 0x629   : > { %3105 = dma.vmem_to_hbm [thread:$0]  (%p5110_p1), %s4963_s10, 8192, %s4961_s24, %s2386_s21, %s3636_s14, %s3636_s14, %s3637_s26  }
 0x62a PF: > { %s5121_s17 = sld [smem:[#allocation15_spill]]  ;;  %s5122_s23 = sld [smem:[#allocation16_spill]] }
 0x62b   : > { %p5124_p6 = scmp.ge.s32.totalorder %s3621_s20, 2 }
 0x630   : > { %s2436_s22 = sand.u32 1, %s5121_s17   ;;  %p5123_p13 = scmp.ne.s32.totalorder %s5122_s23, 0 }
 0x631   : > { %s2437_s25 = scalar_lea.sflag [#allocation4], %s2436_s22 }
 0x632   : > { %p3121_p10 = pnand %p5124_p6, %p5123_p13 }
 0x634   : > { %3600 = dma.done.wait (!%p3121_p10), %s2437_s25, 8192  }
 0x635   : > { %3602 = vsyncadd (!%p3121_p10), %s2437_s25, 4294959104  ;;  %s2446_s30 = scalar_lea.sflag [#allocation10], %s2436_s22 }
 0x636   : > { %3604 = dma.done.wait (!%p3121_p10), %s2446_s30, 2048  }
 0x637   : > { %3606 = vsyncadd (!%p3121_p10), %s2446_s30, 4294965248  ;;  %p29_p1 = scmp.ge.s32.totalorder %s3811_s13, 4   ;;  %s5125_s17 = smov %s3613_s18 }
 0x638   : > { %s5126_s18 = smov %s3617_s19  ;;  %s5127_s19 = smov %s3820_s16 }
 0x639   : > { %s5128_s20 = smov %s3811_s13  ;;  %31 = sbr.rel (!%p29_p1) target bundleno = 10 (0xa), region = 133 }
 0x640   :  { %2451 = vsyncpa [#allocation3], 1 }
 0x641   :  { %2453 = vsyncpa [#allocation3 + $0x1], 1 }
 0x642   :  { %2454 = vsyncpa [#allocation6], 1 }
 0x643   :  { %2455 = vsyncpa [#allocation4], 1 }
 0x644   :  { %2457 = vsyncpa [#allocation4 + $0x1], 1 }
 0x645   :  { %2458 = vsyncpa [#allocation10], 1 }
 0x646   :  { %2460 = vsyncpa [#allocation10 + $0x1], 1 }

</bundles_post_ra>
